<compile_context>
chip_gen: v6e
topology: v6e:2x2x1
jax: 0.10.0
libtpu: 0.0.40
codegen_flags: <defaults>
</compile_context>

<pallas_src>
import functools

import jax
import jax.numpy as jnp
from jax.experimental import pallas as pl
from jax.experimental.pallas import tpu as pltpu

# Logical (PyTorch) dims
IN_DIM = 784      # "initial" in the PyTorch module
H1_DIM = 784      # fc_layer_1 output
H2_DIM = 392      # hidden_layer output = int(784 / 2)
OUT_DIM = 10

# Lane-aligned (padded) output dims of each layer
H1_PAD = 896      # 784 -> 7*128
H2_PAD = 512      # 392 -> 4*128
OUT_PAD = 128     # 10  -> 128

MAX_TILE_B = 1024                 # batch rows per grid step (review: 512-1024)
_TILE_CANDIDATES = (1024, 768, 512, 384, 256, 128)


def _round_up(x, m):
    return ((x + m - 1) // m) * m


def _choose_batch_tile(B, max_tile):
    """Pick (TB, B_pad): TB multiple of 8, B_pad multiple of TB.

    Prefers tiles with <=10% padded-row waste, then >=4 grid steps (keeps both
    v7x TensorCores busy and the x-tile DMA hidden), then the largest tile
    (amortizes per-step overhead)."""
    B8 = _round_up(B, 8)
    if B8 <= max_tile:
        return B8, B8                       # tiny batch: single tile
    cands = [tb for tb in _TILE_CANDIDATES if tb <= max_tile]
    if not cands:                           # degenerate max_tile
        tb = _round_up(min(max_tile, B8), 8)
        return tb, _round_up(B8, tb)
    scored = []
    for tb in cands:
        pad = _round_up(B8, tb)
        waste = (pad - B) / pad
        steps = pad // tb
        scored.append((tb, pad, waste, steps))
    low = [s for s in scored if s[2] <= 0.10] or scored
    low.sort(key=lambda s: (0 if s[3] >= 4 else 1, -s[0]))
    return low[0][0], low[0][1]


def _vmem_limit_bytes(tb):
    """Per-step VMEM footprint with margin (instead of a blanket constant)."""
    x_tile = tb * IN_DIM * 4                # f32 input tile
    out_tile = tb * OUT_PAD * 4             # f32 output tile
    weights = (IN_DIM * H1_PAD + H1_PAD * H2_PAD + H2_PAD * OUT_PAD) * 2  # bf16
    biases = (H1_PAD + H2_PAD + OUT_PAD) * 4
    inter = tb * (H1_PAD * (4 + 2) + H2_PAD * (4 + 2) + OUT_PAD * 4 * 2)
    need = 2 * (x_tile + out_tile) + 2 * (weights + biases) + inter
    # 2x margin for compiler scratch; cap at 40 MiB to keep headroom under
    # v7x's 64 MiB physical VMEM; explicit value lifts v5e's 16 MiB default.
    return int(min(40 * 1024 * 1024, max(16 * 1024 * 1024, 2 * need)))


def mlp_kernel(x_ref, w1_ref, b1_ref, wh_ref, bh_ref, w2_ref, b2_ref, o_ref):
    # fc_layer_1 + ReLU.  x arrives f32; cast to bf16 in-kernel (VPU cast is
    # hidden under the MXU).  bf16 operands, f32 accumulation.
    x = x_ref[...].astype(jnp.bfloat16)                       # (TB, 784)
    h = jnp.dot(x, w1_ref[...], preferred_element_type=jnp.float32) + b1_ref[...]
    h = jnp.maximum(h, 0.0)                                   # (TB, 896) f32

    # hidden_layer + ReLU
    hl = jnp.dot(h.astype(jnp.bfloat16), wh_ref[...],
                 preferred_element_type=jnp.float32) + bh_ref[...]
    hl = jnp.maximum(hl, 0.0)                                 # (TB, 512) f32

    # fc_layer_2 + Softmax(dim=1) over the 10 real classes only
    logits = jnp.dot(hl.astype(jnp.bfloat16), w2_ref[...],
                     preferred_element_type=jnp.float32) + b2_ref[...]
    col = jax.lax.broadcasted_iota(jnp.int32, logits.shape, 1)
    logits = jnp.where(col < OUT_DIM, logits, -jnp.inf)       # kill padded lanes

    m = jnp.max(logits, axis=1, keepdims=True)
    e = jnp.exp(logits - m)
    denom = jnp.sum(e, axis=1, keepdims=True)
    # Exact divide (not approx reciprocal): row sums must hit 1 to ~f32 ulp.
    o_ref[...] = (e / denom).astype(o_ref.dtype)


@functools.partial(jax.jit, static_argnames=("tile_b",))
def method_mlp_forward(x, params, *, tile_b=MAX_TILE_B):
    """x: [B, 784] float32.  params: bf16 weights (in, out-padded) + f32 biases."""
    B = x.shape[0]
    TB, B_pad = _choose_batch_tile(B, tile_b)
    if B_pad != B:
        # Batch-only pad (rare; no feature pad / dtype cast pass over x).
        x = jnp.pad(x, ((0, B_pad - B), (0, 0)))

    w1, b1 = params["w1"], params["b1"]
    wh, bh = params["wh"], params["bh"]
    w2, b2 = params["w2"], params["b2"]

    grid = (B_pad // TB,)

    # x tile streams with the grid; weights/biases pinned in VMEM (index (0,0)).
    in_specs = [
        pl.BlockSpec((TB, IN_DIM), lambda i: (i, 0)),          # lane = full dim (784)
        pl.BlockSpec((IN_DIM, H1_PAD), lambda i: (0, 0)),
        pl.BlockSpec((1, H1_PAD), lambda i: (0, 0)),
        pl.BlockSpec((H1_PAD, H2_PAD), lambda i: (0, 0)),
        pl.BlockSpec((1, H2_PAD), lambda i: (0, 0)),
        pl.BlockSpec((H2_PAD, OUT_PAD), lambda i: (0, 0)),
        pl.BlockSpec((1, OUT_PAD), lambda i: (0, 0)),
    ]
    out_specs = pl.BlockSpec((TB, OUT_PAD), lambda i: (i, 0))

    flops = 2 * B_pad * (IN_DIM * H1_PAD + H1_PAD * H2_PAD + H2_PAD * OUT_PAD)
    bytes_accessed = (
        B_pad * IN_DIM * 4
        + (w1.size + wh.size + w2.size) * 2
        + (b1.size + bh.size + b2.size) * 4
        + B_pad * OUT_PAD * 4
    )
    cost = pl.CostEstimate(flops=flops,
                           transcendentals=B_pad * OUT_PAD,
                           bytes_accessed=bytes_accessed)

    out = pl.pallas_call(
        mlp_kernel,
        out_shape=jax.ShapeDtypeStruct((B_pad, OUT_PAD), jnp.float32),
        grid=grid,
        in_specs=in_specs,
        out_specs=out_specs,
        compiler_params=pltpu.CompilerParams(
            dimension_semantics=("parallel",),
            vmem_limit_bytes=_vmem_limit_bytes(TB),
        ),
        cost_estimate=cost,
    )(x, w1, b1, wh, bh, w2, b2)

    return out[:B, :OUT_DIM]


def init_params(key):
    """PyTorch nn.Linear-style init U(-1/sqrt(fan_in), 1/sqrt(fan_in)).
    Weights stored pre-transposed (in_features, out_features); the output dim
    (and the input dim for layers after the first) is zero-padded to a
    multiple of 128; weights bf16, biases f32."""
    ks = jax.random.split(key, 6)

    def lin(kw, kb, fan_in, fan_out, in_store, out_store):
        bound = 1.0 / jnp.sqrt(fan_in)
        w = jax.random.uniform(kw, (fan_in, fan_out), jnp.float32, -bound, bound)
        b = jax.random.uniform(kb, (1, fan_out), jnp.float32, -bound, bound)
        w = jnp.pad(w, ((0, in_store - fan_in), (0, out_store - fan_out)))
        b = jnp.pad(b, ((0, 0), (0, out_store - fan_out)))
        return w.astype(jnp.bfloat16), b

    w1, b1 = lin(ks[0], ks[1], IN_DIM, H1_DIM, IN_DIM, H1_PAD)   # K unpadded (784)
    wh, bh = lin(ks[2], ks[3], H1_DIM, H2_DIM, H1_PAD, H2_PAD)
    w2, b2 = lin(ks[4], ks[5], H2_DIM, OUT_DIM, H2_PAD, OUT_PAD)
    return {"w1": w1, "b1": b1, "wh": wh, "bh": bh, "w2": w2, "b2": b2}


def reference_forward(x, params):
    """Pure-JAX reference with identical (bf16 operand / f32 accum) numerics."""
    xb = x.astype(jnp.bfloat16)
    h = jnp.maximum(
        jnp.dot(xb, params["w1"], preferred_element_type=jnp.float32)
        + params["b1"], 0.0)
    hl = jnp.maximum(
        jnp.dot(h.astype(jnp.bfloat16), params["wh"],
                preferred_element_type=jnp.float32) + params["bh"], 0.0)
    logits = jnp.dot(hl.astype(jnp.bfloat16), params["w2"],
                     preferred_element_type=jnp.float32) + params["b2"]
    return jax.nn.softmax(logits[:, :OUT_DIM], axis=1)


if __name__ == "__main__":
    key = jax.random.PRNGKey(0)
    k_param, k_x = jax.random.split(key)
    params = init_params(k_param)

    B = 8
    x = jax.random.normal(k_x, (B, IN_DIM), jnp.float32)

    y = method_mlp_forward(x, params)
    jax.block_until_ready(y)

    # sanity: shape, softmax rows sum to 1, matches pure-JAX reference
    assert y.shape == (B, OUT_DIM)
    row_sums = jnp.sum(y, axis=1)
    assert jnp.allclose(row_sums, jnp.ones_like(row_sums), atol=1e-4), row_sums
    y_ref = reference_forward(x, params)
    assert jnp.allclose(y, y_ref, atol=2e-3), float(jnp.max(jnp.abs(y - y_ref)))

    print("KERNEL_OK")
</pallas_src>

<mosaic_0001>
module attributes {stable_mosaic.version = 11 : i64} {
  func.func @mlp_kernel(%arg0: i32, %arg1: memref<8x784xf32, #tpu.memory_space<vmem>>, %arg2: memref<784x896xbf16, #tpu.memory_space<vmem>>, %arg3: memref<1x896xf32, #tpu.memory_space<vmem>>, %arg4: memref<896x512xbf16, #tpu.memory_space<vmem>>, %arg5: memref<1x512xf32, #tpu.memory_space<vmem>>, %arg6: memref<512x128xbf16, #tpu.memory_space<vmem>>, %arg7: memref<1x128xf32, #tpu.memory_space<vmem>>, %arg8: memref<8x128xf32, #tpu.memory_space<vmem>>) attributes {dimension_semantics = [#tpu.dimension_semantics<parallel>], iteration_bounds = array<i64: 1>, scalar_prefetch = 0 : i64, scratch_operands = 0 : i64, tpu.core_type = #tpu.core_type<tc>, window_params = [{transform_indices = @transform_0, window_bounds = array<i64: 8, 784>}, {pipeline_mode = #tpu.pipeline_mode<synchronous>, transform_indices = @transform_1, window_bounds = array<i64: 784, 896>}, {pipeline_mode = #tpu.pipeline_mode<synchronous>, transform_indices = @transform_2, window_bounds = array<i64: 1, 896>}, {pipeline_mode = #tpu.pipeline_mode<synchronous>, transform_indices = @transform_3, window_bounds = array<i64: 896, 512>}, {pipeline_mode = #tpu.pipeline_mode<synchronous>, transform_indices = @transform_4, window_bounds = array<i64: 1, 512>}, {pipeline_mode = #tpu.pipeline_mode<synchronous>, transform_indices = @transform_5, window_bounds = array<i64: 512, 128>}, {pipeline_mode = #tpu.pipeline_mode<synchronous>, transform_indices = @transform_6, window_bounds = array<i64: 1, 128>}, {transform_indices = @transform_7, window_bounds = array<i64: 8, 128>}]} {
    %c0 = arith.constant 0 : index
    %c0_0 = arith.constant 0 : index
    %0 = vector.load %arg1[%c0, %c0_0] : memref<8x784xf32, #tpu.memory_space<vmem>>, vector<8x784xf32>
    %1 = arith.truncf %0 : vector<8x784xf32> to vector<8x784xbf16>
    %c0_1 = arith.constant 0 : index
    %c0_2 = arith.constant 0 : index
    %2 = vector.load %arg2[%c0_1, %c0_2] : memref<784x896xbf16, #tpu.memory_space<vmem>>, vector<784x896xbf16>
    %cst = arith.constant dense<0.000000e+00> : vector<8x896xf32>
    %3 = tpu.matmul %1, %2, %cst {dimension_numbers = #tpu.dot_dimension_numbers<[1], [0], [0], [1], [0, 0, 1, 1], [], []>} : vector<8x784xbf16>, vector<784x896xbf16>, vector<8x896xf32> -> vector<8x896xf32>
    %c0_3 = arith.constant 0 : index
    %c0_4 = arith.constant 0 : index
    %4 = vector.load %arg3[%c0_3, %c0_4] : memref<1x896xf32, #tpu.memory_space<vmem>>, vector<1x896xf32>
    %5 = vector.broadcast %4 : vector<1x896xf32> to vector<8x896xf32>
    %6 = arith.addf %3, %5 : vector<8x896xf32>
    %cst_5 = arith.constant 0.000000e+00 : f32
    %7 = vector.broadcast %cst_5 : f32 to vector<8x896xf32>
    %8 = arith.maximumf %6, %7 : vector<8x896xf32>
    %9 = arith.truncf %8 : vector<8x896xf32> to vector<8x896xbf16>
    %c0_6 = arith.constant 0 : index
    %c0_7 = arith.constant 0 : index
    %10 = vector.load %arg4[%c0_6, %c0_7] : memref<896x512xbf16, #tpu.memory_space<vmem>>, vector<896x512xbf16>
    %cst_8 = arith.constant dense<0.000000e+00> : vector<8x512xf32>
    %11 = tpu.matmul %9, %10, %cst_8 {dimension_numbers = #tpu.dot_dimension_numbers<[1], [0], [0], [1], [0, 0, 1, 1], [], []>} : vector<8x896xbf16>, vector<896x512xbf16>, vector<8x512xf32> -> vector<8x512xf32>
    %c0_9 = arith.constant 0 : index
    %c0_10 = arith.constant 0 : index
    %12 = vector.load %arg5[%c0_9, %c0_10] : memref<1x512xf32, #tpu.memory_space<vmem>>, vector<1x512xf32>
    %13 = vector.broadcast %12 : vector<1x512xf32> to vector<8x512xf32>
    %14 = arith.addf %11, %13 : vector<8x512xf32>
    %cst_11 = arith.constant 0.000000e+00 : f32
    %15 = vector.broadcast %cst_11 : f32 to vector<8x512xf32>
    %16 = arith.maximumf %14, %15 : vector<8x512xf32>
    %17 = arith.truncf %16 : vector<8x512xf32> to vector<8x512xbf16>
    %c0_12 = arith.constant 0 : index
    %c0_13 = arith.constant 0 : index
    %18 = vector.load %arg6[%c0_12, %c0_13] : memref<512x128xbf16, #tpu.memory_space<vmem>>, vector<512x128xbf16>
    %cst_14 = arith.constant dense<0.000000e+00> : vector<8x128xf32>
    %19 = tpu.matmul %17, %18, %cst_14 {dimension_numbers = #tpu.dot_dimension_numbers<[1], [0], [0], [1], [0, 0, 1, 1], [], []>} : vector<8x512xbf16>, vector<512x128xbf16>, vector<8x128xf32> -> vector<8x128xf32>
    %c0_15 = arith.constant 0 : index
    %c0_16 = arith.constant 0 : index
    %20 = vector.load %arg7[%c0_15, %c0_16] : memref<1x128xf32, #tpu.memory_space<vmem>>, vector<1x128xf32>
    %21 = vector.broadcast %20 : vector<1x128xf32> to vector<8x128xf32>
    %22 = arith.addf %19, %21 : vector<8x128xf32>
    %23 = tpu.iota {dimensions = array<i32: 1>} : vector<8x128xi32>
    %c10_i32 = arith.constant 10 : i32
    %24 = vector.broadcast %c10_i32 : i32 to vector<8x128xi32>
    %25 = arith.cmpi slt, %23, %24 : vector<8x128xi32>
    %cst_17 = arith.constant 0xFF800000 : f32
    %26 = vector.broadcast %cst_17 : f32 to vector<8x128xf32>
    %27 = arith.select %25, %22, %26 : vector<8x128xi1>, vector<8x128xf32>
    %cst_18 = arith.constant dense<0xFF800000> : vector<8xf32>
    %28 = vector.multi_reduction <maximumf>, %27, %cst_18 [1] : vector<8x128xf32> to vector<8xf32>
    %29 = vector.shape_cast %28 : vector<8xf32> to vector<8x1xf32>
    %30 = vector.broadcast %29 : vector<8x1xf32> to vector<8x128xf32>
    %31 = arith.subf %27, %30 : vector<8x128xf32>
    %32 = math.exp %31 : vector<8x128xf32>
    %cst_19 = arith.constant dense<0.000000e+00> : vector<8xf32>
    %33 = vector.multi_reduction <add>, %32, %cst_19 [1] : vector<8x128xf32> to vector<8xf32>
    %34 = vector.shape_cast %33 : vector<8xf32> to vector<8x1xf32>
    %35 = vector.broadcast %34 : vector<8x1xf32> to vector<8x128xf32>
    %36 = arith.divf %32, %35 : vector<8x128xf32>
    %c0_20 = arith.constant 0 : index
    %c0_21 = arith.constant 0 : index
    %37 = vector.load %arg8[%c0_20, %c0_21] : memref<8x128xf32, #tpu.memory_space<vmem>>, vector<8x128xf32>
    tpu.vector_store %arg8[%c0_20, %c0_21], %36 {strides = array<i32>} : memref<8x128xf32, #tpu.memory_space<vmem>>, vector<8x128xf32>,
    return
  }
  func.func @transform_0(%arg0: i32) -> (i32, i32) {
    %c0_i32 = arith.constant 0 : i32
    %c0_i32_0 = arith.constant 0 : i32
    return %arg0, %c0_i32 : i32, i32
  }
  func.func @transform_1(%arg0: i32) -> (i32, i32) {
    %c0_i32 = arith.constant 0 : i32
    %c0_i32_0 = arith.constant 0 : i32
    %c0_i32_1 = arith.constant 0 : i32
    return %c0_i32, %c0_i32_0 : i32, i32
  }
  func.func @transform_2(%arg0: i32) -> (i32, i32) {
    %c0_i32 = arith.constant 0 : i32
    %c0_i32_0 = arith.constant 0 : i32
    %c0_i32_1 = arith.constant 0 : i32
    return %c0_i32, %c0_i32_0 : i32, i32
  }
  func.func @transform_3(%arg0: i32) -> (i32, i32) {
    %c0_i32 = arith.constant 0 : i32
    %c0_i32_0 = arith.constant 0 : i32
    %c0_i32_1 = arith.constant 0 : i32
    return %c0_i32, %c0_i32_0 : i32, i32
  }
  func.func @transform_4(%arg0: i32) -> (i32, i32) {
    %c0_i32 = arith.constant 0 : i32
    %c0_i32_0 = arith.constant 0 : i32
    %c0_i32_1 = arith.constant 0 : i32
    return %c0_i32, %c0_i32_0 : i32, i32
  }
  func.func @transform_5(%arg0: i32) -> (i32, i32) {
    %c0_i32 = arith.constant 0 : i32
    %c0_i32_0 = arith.constant 0 : i32
    %c0_i32_1 = arith.constant 0 : i32
    return %c0_i32, %c0_i32_0 : i32, i32
  }
  func.func @transform_6(%arg0: i32) -> (i32, i32) {
    %c0_i32 = arith.constant 0 : i32
    %c0_i32_0 = arith.constant 0 : i32
    %c0_i32_1 = arith.constant 0 : i32
    return %c0_i32, %c0_i32_0 : i32, i32
  }
  func.func @transform_7(%arg0: i32) -> (i32, i32) {
    %c0_i32 = arith.constant 0 : i32
    %c0_i32_0 = arith.constant 0 : i32
    return %arg0, %c0_i32 : i32, i32
  }
}

</mosaic_0001>

<bundles_post_ra>
// kernel: method_mlp_forward.1
= control target key start
LH: loop header
LB: loop body
LE: loop exit
PB: predicated region body
PF: predicated region fallthrough
CT: control target
= control target key end

     0   :  { %12 = vsyncpa [#allocation3], 0  ;;  %s7068_s0 = inlined_call_operand.hbm [shape: f32[8,784], index: 0, kind: input, shape index: {}]   ;;  %s7069_s1 = inlined_call_operand.hbm [shape: bf16[784,896], index: 1, kind: input, shape index: {}]   ;;  %s7070_s2 = inlined_call_operand.hbm [shape: f32[1,896], index: 2, kind: input, shape index: {}]   ;;  %s7071_s3 = inlined_call_operand.hbm [shape: bf16[896,512], index: 3, kind: input, shape index: {}]   ;;  %s7072_s4 = inlined_call_operand.hbm [shape: f32[1,512], index: 4, kind: input, shape index: {}]   ;;  %s7073_s5 = inlined_call_operand.hbm [shape: bf16[512,128], index: 5, kind: input, shape index: {}]   ;;  %s7074_s6 = inlined_call_operand.hbm [shape: f32[1,128], index: 6, kind: input, shape index: {}]   ;;  %s7075_s7 = inlined_call_operand.hbm [shape: f32[8,128], index: 7, kind: output, shape index: {}]  }
   0x1   :  { %13 = vsyncpa [#allocation6], 0 }
   0x2   :  { %14 = vsyncpa [#allocation9], 0 }
   0x3   :  { %15 = vsyncpa [#allocation12], 0 }
   0x4   :  { %16 = vsyncpa [#allocation4], 0  ;;  %s6841_s24 = smov [#allocation5]  }
   0x5   :  { %s32_s25 = sshll.u32 %s6841_s24, 4  ;;  %s33_s25 = int_to_ptr.vmem [resolvable:$true] %s32_s25 }
   0x6   :  { %s6679_s26 = scalar_lea.vmem %s33_s25, 43904  ;;  %p6684_p1 = scmp.lt.s32.totalorder %s33_s25, %s33_s25 }
   0x7   :  { %p6680_p0 = scmp.ne.s32.totalorder %s33_s25, %s6679_s26  ;;  %p6685_p2 = scmp.lt.s32.totalorder %s6679_s26, %s6679_s26 }
   0x9   :  { %p6686_p3 = por %p6685_p2, %p6684_p1 }
   0xb   :  { %p6687_p4 = pnand %p6686_p3, %p6680_p0 }
   0xd   :  { %6690 = shalt.err (!%p6687_p4)
}
   0xe   :  { %s6842_s27 = smov 448   ;;  %s6843_s28 = smov 28  }
   0xf   :  { %38 = dma.hbm_to_vmem [thread:$0]  %s7069_s1, 43904, %s33_s25, [#allocation6], %s6842_s27, %s6842_s27, %s6843_s28  }
  0x10   :  { %s6844_s8 = smov [#allocation8]  }
  0x11   :  { %s54_s9 = sshll.u32 %s6844_s8, 4  ;;  %s55_s9 = int_to_ptr.vmem [resolvable:$true] %s54_s9 }
  0x12   :  { %s6699_s10 = scalar_lea.vmem %s55_s9, 28672  ;;  %p6704_p6 = scmp.lt.s32.totalorder %s55_s9, %s55_s9 }
  0x13   :  { %p6700_p5 = scmp.ne.s32.totalorder %s55_s9, %s6699_s10  ;;  %p6705_p7 = scmp.lt.s32.totalorder %s6699_s10, %s6699_s10 }
  0x15   :  { %p6706_p8 = por %p6705_p7, %p6704_p6 }
  0x17   :  { %p6707_p9 = pnand %p6706_p8, %p6700_p5 }
  0x19   :  { %6710 = shalt.err (!%p6707_p9)
}
  0x1a   :  { %s6845_s11 = smov 256   ;;  %s6846_s12 = smov 16  }
  0x1b   :  { %60 = dma.hbm_to_vmem [thread:$0]  %s7071_s3, 28672, %s55_s9, [#allocation9], %s6845_s11, %s6845_s11, %s6846_s12  }
  0x1c   :  { %s6847_s15 = smov [#allocation11]  }
  0x1d   :  { %s76_s16 = sshll.u32 %s6847_s15, 4  ;;  %s77_s16 = int_to_ptr.vmem [resolvable:$true] %s76_s16 }
  0x1e   :  { %s6719_s1 = scalar_lea.vmem %s77_s16, 4096  ;;  %p6724_p11 = scmp.lt.s32.totalorder %s77_s16, %s77_s16 }
  0x1f   :  { %p6720_p10 = scmp.ne.s32.totalorder %s77_s16, %s6719_s1  ;;  %p6725_p12 = scmp.lt.s32.totalorder %s6719_s1, %s6719_s1 }
  0x21   :  { %p6726_p13 = por %p6725_p12, %p6724_p11 }
  0x23   :  { %p6727_p0 = pnand %p6726_p13, %p6720_p10 }
  0x25   :  { %6730 = shalt.err (!%p6727_p0)
}
  0x26   :  { %s6848_s17 = smov 64   ;;  %s6849_s18 = smov 4  }
  0x27   :  { %82 = dma.hbm_to_vmem [thread:$0]  %s7073_s5, 4096, %s77_s16, [#allocation12], %s6848_s17, %s6848_s17, %s6849_s18  }
  0x28   :  { %s6850_s21 = smov [#allocation2]   ;;  %s6851_s3 = smov [#allocation7]  }
  0x29   :  { %s23_s22 = sshll.u32 %s6850_s21, 4  ;;  %s45_s23 = sshll.u32 %s6851_s3, 4  ;;  %s24_s22 = int_to_ptr.vmem [resolvable:$true] %s23_s22  ;;  %s46_s23 = int_to_ptr.vmem [resolvable:$true] %s45_s23 }
  0x2a   :  { %s6739_s24 = scalar_lea.vmem %s24_s22, 896  ;;  %p6744_p2 = scmp.lt.s32.totalorder %s24_s22, %s24_s22 }
  0x2b   :  { %p6740_p1 = scmp.ne.s32.totalorder %s24_s22, %s6739_s24  ;;  %p6745_p3 = scmp.lt.s32.totalorder %s6739_s24, %s6739_s24 }
  0x2d   :  { %p6746_p4 = por %p6745_p3, %p6744_p2 }
  0x2f   :  { %p6747_p5 = pnand %p6746_p4, %p6740_p1 }
  0x31   :  { %6750 = shalt.err (!%p6747_p5)
}
  0x32   :  { %26 = dma.hbm_to_vmem [thread:$0]  %s7068_s0, 896, %s24_s22, [#allocation3]  }
  0x33   :  { %s6759_s27 = scalar_lea.vmem %s46_s23, 112  ;;  %s6763_s5 = scalar_lea.vmem %s46_s23, 128 }
  0x34   :  { %p6760_p6 = scmp.ne.s32.totalorder %s46_s23, %s6759_s27  ;;  %p6764_p7 = scmp.lt.s32.totalorder %s46_s23, %s46_s23 }
  0x35   :  { %p6765_p8 = scmp.lt.s32.totalorder %s6763_s5, %s6759_s27 }
  0x37   :  { %p6766_p9 = por %p6765_p8, %p6764_p7 }
  0x39   :  { %p6767_p10 = pnand %p6766_p9, %p6760_p6 }
  0x3b   :  { %6770 = shalt.err (!%p6767_p10)
}
  0x3c   :  { %48 = dma.hbm_to_vmem [thread:$0]  %s7070_s2, 112, %s46_s23, [#allocation6]  }
  0x3d   :  { %s6852_s30 = smov [#allocation10]   ;;  %s6853_s9 = smov [#allocation13]  }
  0x3e   :  { %s67_s8 = sshll.u32 %s6852_s30, 4  ;;  %s89_s10 = sshll.u32 %s6853_s9, 4  ;;  %s68_s8 = int_to_ptr.vmem [resolvable:$true] %s67_s8  ;;  %s90_s10 = int_to_ptr.vmem [resolvable:$true] %s89_s10 }
  0x3f   :  { %s6779_s11 = scalar_lea.vmem %s68_s8, 64  ;;  %p6784_p12 = scmp.lt.s32.totalorder %s68_s8, %s68_s8 }
  0x40   :  { %p6780_p11 = scmp.ne.s32.totalorder %s68_s8, %s6779_s11  ;;  %p6785_p13 = scmp.lt.s32.totalorder %s6779_s11, %s6779_s11 }
  0x42   :  { %p6786_p0 = por %p6785_p13, %p6784_p12 }
  0x44   :  { %p6787_p1 = pnand %p6786_p0, %p6780_p11 }
  0x46   :  { %6790 = shalt.err (!%p6787_p1)
}
  0x47   :  { %70 = dma.hbm_to_vmem [thread:$0]  %s7072_s4, 64, %s68_s8, [#allocation9]  }
  0x48   :  { %s6799_s13 = scalar_lea.vmem %s90_s10, 16  ;;  %s6803_s2 = scalar_lea.vmem %s90_s10, 32 }
  0x49   :  { %p6800_p2 = scmp.ne.s32.totalorder %s90_s10, %s6799_s13  ;;  %p6804_p3 = scmp.lt.s32.totalorder %s90_s10, %s90_s10 }
  0x4a   :  { %p6805_p4 = scmp.lt.s32.totalorder %s6803_s2, %s6799_s13 }
  0x4c   :  { %p6806_p5 = por %p6805_p4, %p6804_p3 }
  0x4e   :  { %p6807_p6 = pnand %p6806_p5, %p6800_p2 }
  0x50   :  { %6810 = shalt.err (!%p6807_p6)
}
  0x51   :  { %92 = dma.hbm_to_vmem [thread:$0]  %s7074_s6, 16, %s90_s10, [#allocation12]  }
  0x52   :  { %6831 = dma.done.wait [#allocation3], 896  }
  0x53   :  { %6832 = vsyncadd [#allocation3], 4294966400 }
  0x54   :  { %6833 = dma.done.wait [#allocation6], 44016  }
  0x55   :  { %6834 = vsyncadd [#allocation6], 4294923280 }
  0x56   :  { %6835 = dma.done.wait [#allocation9], 28736  }
  0x57   :  { %6836 = vsyncadd [#allocation9], 4294938560 }
  0x58   :  { %6837 = dma.done.wait [#allocation12], 4112  }
  0x59   :  { %6838 = vsyncadd [#allocation12], 4294963184  ;;  %v5808_v0 = vld [vmem:[#allocation5 + $0x18c] ss:$28 sps:$4 sm:$0xff]   ;;  %v5814_v4 = vld [vmem:[#allocation5 + $0x154] ss:$28 sps:$4 sm:$0xff]  }
  0x5a   :  { %v5810_v1 = vld [vmem:[#allocation5 + $0x50c] ss:$28 sps:$4 sm:$0xff]   ;;  %2326 = vmatprep.subr.bf16.mxu0 %v5808_v0  ;;  %v5816_v5 = vld [vmem:[#allocation5 + $0x4d4] ss:$28 sps:$4 sm:$0xff]   ;;  %v5820_v8 = vld [vmem:[#allocation5 + $0x11c] ss:$28 sps:$4 sm:$0xff]  }
  0x5b   :  { %v5812_v2 = vld [vmem:[#allocation5 + $0x188] ss:$28 sps:$4 sm:$0xff]   ;;  %2367 = vmatprep.subr.bf16.mxu1 %v5810_v1  ;;  %v5818_v6 = vld [vmem:[#allocation5 + $0x150] ss:$28 sps:$4 sm:$0xff]   ;;  %v5822_v9 = vld [vmem:[#allocation5 + $0x49c] ss:$28 sps:$4 sm:$0xff]  }
  0x5c   :  { %v5813_v3 = vld [vmem:[#allocation5 + $0x508] ss:$28 sps:$4 sm:$0xff]   ;;  %2327 = vmatpush1.bf16.msra.mxu0 %v5812_v2  ;;  %v5819_v7 = vld [vmem:[#allocation5 + $0x4d0] ss:$28 sps:$4 sm:$0xff]   ;;  %v5824_v10 = vld [vmem:[#allocation5 + $0x118] ss:$28 sps:$4 sm:$0xff]  }
  0x5d   :  { %2368 = vmatpush1.bf16.msra.mxu1 %v5813_v3  ;;  %2328 = vmatprep.subr.bf16.mxu0 %v5814_v4  ;;  %v5825_v11 = vld [vmem:[#allocation5 + $0x498] ss:$28 sps:$4 sm:$0xff]   ;;  %v5826_v12 = vld [vmem:[#allocation5 + $0xe4] ss:$28 sps:$4 sm:$0xff]   ;;  %v5832_v16 = vld [vmem:[#allocation5 + $0xac] ss:$28 sps:$4 sm:$0xff]  }
  0x5e   :  { %2369 = vmatprep.subr.bf16.mxu1 %v5816_v5  ;;  %v5828_v13 = vld [vmem:[#allocation5 + $0x464] ss:$28 sps:$4 sm:$0xff]   ;;  %v5834_v17 = vld [vmem:[#allocation5 + $0x42c] ss:$28 sps:$4 sm:$0xff]   ;;  %v5838_v20 = vld [vmem:[#allocation5 + $0x74] ss:$28 sps:$4 sm:$0xff]  }
  0x5f   :  { %v5830_v14 = vld [vmem:[#allocation5 + $0xe0] ss:$28 sps:$4 sm:$0xff]   ;;  %v5836_v18 = vld [vmem:[#allocation5 + $0xa8] ss:$28 sps:$4 sm:$0xff]   ;;  %v5840_v21 = vld [vmem:[#allocation5 + $0x3f4] ss:$28 sps:$4 sm:$0xff]  }
  0x60   :  { %2329 = vmatpush1.bf16.msra.mxu0 %v5818_v6  ;;  %v5831_v15 = vld [vmem:[#allocation5 + $0x460] ss:$28 sps:$4 sm:$0xff]   ;;  %v5837_v19 = vld [vmem:[#allocation5 + $0x428] ss:$28 sps:$4 sm:$0xff]   ;;  %v5842_v22 = vld [vmem:[#allocation5 + $0x70] ss:$28 sps:$4 sm:$0xff]  }
  0x61   :  { %2370 = vmatpush1.bf16.msra.mxu1 %v5819_v7  ;;  %2330 = vmatprep.subr.bf16.mxu0 %v5820_v8  ;;  %v5843_v23 = vld [vmem:[#allocation5 + $0x3f0] ss:$28 sps:$4 sm:$0xff]   ;;  %v5844_v24 = vld [vmem:[#allocation5 + $0x3c] ss:$28 sps:$4 sm:$0xff]   ;;  %v5850_v28 = vld [vmem:[#allocation5 + $0x4] ss:$28 sps:$4 sm:$0xff]  }
  0x62   :  { %2371 = vmatprep.subr.bf16.mxu1 %v5822_v9  ;;  %v5846_v25 = vld [vmem:[#allocation5 + $0x3bc] ss:$28 sps:$4 sm:$0xff]   ;;  %v5852_v29 = vld [vmem:[#allocation5 + $0x384] ss:$28 sps:$4 sm:$0xff]   ;;  %v5856_v32 = vld [vmem:[#allocation5 + $0x34c] ss:$28 sps:$4 sm:$0xff]  }
  0x63   :  { %v5848_v26 = vld [vmem:[#allocation5 + $0x38] ss:$28 sps:$4 sm:$0xff]   ;;  %v5854_v30 = vld [vmem:[#allocation5] ss:$28 sps:$4 sm:$0xff]   ;;  %v5858_v33 = vld [vmem:[#allocation5 + $0x6cc] ss:$28 sps:$4 sm:$0xff]  }
  0x64   :  { %2331 = vmatpush1.bf16.msra.mxu0 %v5824_v10  ;;  %v5849_v27 = vld [vmem:[#allocation5 + $0x3b8] ss:$28 sps:$4 sm:$0xff]   ;;  %v5855_v31 = vld [vmem:[#allocation5 + $0x380] ss:$28 sps:$4 sm:$0xff]   ;;  %v5860_v34 = vld [vmem:[#allocation5 + $0x348] ss:$28 sps:$4 sm:$0xff]  }
  0x65   :  { %2372 = vmatpush1.bf16.msra.mxu1 %v5825_v11  ;;  %2332 = vmatprep.subr.bf16.mxu0 %v5826_v12  ;;  %v5861_v35 = vld [vmem:[#allocation5 + $0x6c8] ss:$28 sps:$4 sm:$0xff]   ;;  %v5862_v36 = vld [vmem:[#allocation5 + $0x314] ss:$28 sps:$4 sm:$0xff]   ;;  %v5868_v40 = vld [vmem:[#allocation5 + $0x2dc] ss:$28 sps:$4 sm:$0xff]  }
  0x66   :  { %2373 = vmatprep.subr.bf16.mxu1 %v5828_v13  ;;  %v5864_v37 = vld [vmem:[#allocation5 + $0x694] ss:$28 sps:$4 sm:$0xff]   ;;  %v5870_v41 = vld [vmem:[#allocation5 + $0x65c] ss:$28 sps:$4 sm:$0xff]   ;;  %v5874_v44 = vld [vmem:[#allocation5 + $0x2a4] ss:$28 sps:$4 sm:$0xff]  }
  0x67   :  { %v5866_v38 = vld [vmem:[#allocation5 + $0x310] ss:$28 sps:$4 sm:$0xff]   ;;  %v5872_v42 = vld [vmem:[#allocation5 + $0x2d8] ss:$28 sps:$4 sm:$0xff]   ;;  %v5876_v45 = vld [vmem:[#allocation5 + $0x624] ss:$28 sps:$4 sm:$0xff]  }
  0x68   :  { %2333 = vmatpush1.bf16.msra.mxu0 %v5830_v14  ;;  %v5867_v39 = vld [vmem:[#allocation5 + $0x690] ss:$28 sps:$4 sm:$0xff]   ;;  %v5873_v43 = vld [vmem:[#allocation5 + $0x658] ss:$28 sps:$4 sm:$0xff]   ;;  %v5878_v47 = vld [vmem:[#allocation5 + $0x2a0] ss:$28 sps:$4 sm:$0xff]  }
  0x69   :  { %2374 = vmatpush1.bf16.msra.mxu1 %v5831_v15  ;;  %2334 = vmatprep.subr.bf16.mxu0 %v5832_v16  ;;  %v116_v46 = vld [vmem:[#allocation2 + $0x8] sm:$0xff]  ;;  %v5879_v48 = vld [vmem:[#allocation5 + $0x620] ss:$28 sps:$4 sm:$0xff]   ;;  %v5880_v51 = vld [vmem:[#allocation5 + $0x26c] ss:$28 sps:$4 sm:$0xff]   ;;  %v6854_v16 = vmov 0  }
  0x6a   :  { %2375 = vmatprep.subr.bf16.mxu1 %v5834_v17  ;;  %v6919_v49 = vpack.c.bf16 %v116_v46, %v116_v46  ;;  %v118_v50 = vld [vmem:[#allocation2 + $0x18] sm:$0xff]  ;;  %v5882_v53 = vld [vmem:[#allocation5 + $0x5ec] ss:$28 sps:$4 sm:$0xff]   ;;  %v5886_v56 = vld [vmem:[#allocation5 + $0x234] ss:$28 sps:$4 sm:$0xff]   ;;  %vm2322_vm0 = vcmask 130048  }
  0x6b   :  { %v6921_v52 = vpack.c.bf16 %v118_v50, %v118_v50  ;;  %v5884_v54 = vld [vmem:[#allocation5 + $0x268] ss:$28 sps:$4 sm:$0xff]   ;;  %v5888_v57 = vld [vmem:[#allocation5 + $0x5b4] ss:$28 sps:$4 sm:$0xff]   ;;  %v5892_v60 = vld [vmem:[#allocation5 + $0x1fc] ss:$28 sps:$4 sm:$0xff]  }
  0x6c   :  { %2335 = vmatpush1.bf16.msra.mxu0 %v5836_v18  ;;  %2358 = vmatprep.mubr.bf16.mxu0 %v6919_v49  ;;  %v5885_v55 = vld [vmem:[#allocation5 + $0x5e8] ss:$28 sps:$4 sm:$0xff]   ;;  %v5890_v58 = vld [vmem:[#allocation5 + $0x230] ss:$28 sps:$4 sm:$0xff]   ;;  %v5894_v61 = vld [vmem:[#allocation5 + $0x57c] ss:$28 sps:$4 sm:$0xff]  }
  0x6d   :  { %2376 = vmatpush1.bf16.msra.mxu1 %v5837_v19  ;;  %2336 = vmatprep.subr.bf16.mxu0 %v5838_v20  ;;  %v5891_v59 = vld [vmem:[#allocation5 + $0x5b0] ss:$28 sps:$4 sm:$0xff]   ;;  %v5896_v62 = vld [vmem:[#allocation5 + $0x1f8] ss:$28 sps:$4 sm:$0xff]   ;;  %v5898_v0 = vld [vmem:[#allocation5 + $0x1c4] ss:$28 sps:$4 sm:$0xff]  }
  0x6e   :  { %2377 = vmatprep.subr.bf16.mxu1 %v5840_v21  ;;  %2399 = vmatprep.mubr.bf16.mxu1 %v6921_v52  ;;  %v5897_v63 = vld [vmem:[#allocation5 + $0x578] ss:$28 sps:$4 sm:$0xff]   ;;  %v5900_v1 = vld [vmem:[#allocation5 + $0x544] ss:$28 sps:$4 sm:$0xff]   ;;  %v115_v4 = vld [vmem:[#allocation2] sm:$0xff]  ;;  %vm6856_vm1 = vmmov 0  }
  0x6f   :  { %v5902_v2 = vld [vmem:[#allocation5 + $0x1c0] ss:$28 sps:$4 sm:$0xff]   ;;  %v5906_v6 = vld [vmem:[#allocation5 + $0x88c] ss:$28 sps:$4 sm:$0xff]   ;;  %v6925_v8 = vpack.c.bf16 %v115_v4, %v115_v4  ;;  %v5912_v12 = vld [vmem:[#allocation5 + $0x854] ss:$28 sps:$4 sm:$0xff]  }
  0x70   :  { %2337 = vmatpush1.bf16.msra.mxu0 %v5842_v22  ;;  %v5903_v3 = vld [vmem:[#allocation5 + $0x540] ss:$28 sps:$4 sm:$0xff]   ;;  %v5904_v10 = vld [vmem:[#allocation5 + $0x888] ss:$28 sps:$4 sm:$0xff]   ;;  %v5915_v13 = vld [vmem:[#allocation5 + $0x194] ss:$28 sps:$4 sm:$0xff]  }
  0x71   :  { %2378 = vmatpush1.bf16.msra.mxu1 %v5843_v23  ;;  %2338 = vmatprep.subr.bf16.mxu0 %v5844_v24  ;;  %v117_v5 = vld [vmem:[#allocation2 + $0x10] sm:$0xff]  ;;  %v5909_v7 = vld [vmem:[#allocation5 + $0xa84] ss:$28 sps:$4 sm:$0xff]   ;;  %v5910_v14 = vld [vmem:[#allocation5 + $0x850] ss:$28 sps:$4 sm:$0xff]   ;;  %s6857_s4 = smov [#allocation14]  }
  0x72   :  { %2379 = vmatprep.subr.bf16.mxu1 %v5846_v25  ;;  %v6927_v9 = vpack.c.bf16 %v117_v5, %v117_v5  ;;  %v5907_v11 = vld [vmem:[#allocation5 + $0xa80] ss:$28 sps:$4 sm:$0xff]   ;;  %v5913_v18 = vld [vmem:[#allocation5 + $0x190] ss:$28 sps:$4 sm:$0xff]   ;;  %v5916_v20 = vld [vmem:[#allocation5 + $0x818] ss:$28 sps:$4 sm:$0xff]  }
  0x73   :  { %v121_v15 = vld [vmem:[#allocation2 + $0x30] sm:$0xff]  ;;  %v5924_v22 = vld [vmem:[#allocation5 + $0x7e4] ss:$28 sps:$4 sm:$0xff]   ;;  %v5982_v4 = vld [vmem:[#allocation5 + $0x930] ss:$28 sps:$4 sm:$0xff]   ;;  %s5057_s6 = sshll.u32 %s6857_s4, 4  ;;  %s5058_s6 = int_to_ptr.vmem [resolvable:$true] %s5057_s6 }
  0x74   :  { %2339 = vmatpush1.bf16.msra.mxu0 %v5848_v26  ;;  %v5918_v17 = vld [vmem:[#allocation5 + $0x81c] ss:$28 sps:$4 sm:$0xff]   ;;  %v6932_v19 = vpack.c.bf16 %v121_v15, %v121_v15  ;;  %v5927_v25 = vld [vmem:[#allocation5 + $0x124] ss:$28 sps:$4 sm:$0xff]   ;;  %v5930_v26 = vld [vmem:[#allocation5 + $0x7ac] ss:$28 sps:$4 sm:$0xff]   ;;  %p6816_p8 = scmp.lt.s32.totalorder %s5058_s6, %s5058_s6 }
  0x75   :  { %2380 = vmatpush1.bf16.msra.mxu1 %v5849_v27  ;;  %2340 = vmatprep.subr.bf16.mxu0 %v5850_v28  ;;  %v5921_v21 = vld [vmem:[#allocation5 + $0x15c] ss:$28 sps:$4 sm:$0xff]   ;;  %v5928_v28 = vld [vmem:[#allocation5 + $0x7a8] ss:$28 sps:$4 sm:$0xff]   ;;  %v5987_v5 = vld [vmem:[#allocation5 + $0x274] ss:$28 sps:$4 sm:$0xff]  }
  0x76   :  { %2381 = vmatprep.subr.bf16.mxu1 %v5852_v29  ;;  %v5919_v23 = vld [vmem:[#allocation5 + $0x158] ss:$28 sps:$4 sm:$0xff]   ;;  %v5922_v24 = vld [vmem:[#allocation5 + $0x7e0] ss:$28 sps:$4 sm:$0xff]   ;;  %v5933_v29 = vld [vmem:[#allocation5 + $0xec] ss:$28 sps:$4 sm:$0xff]  }
  0x77   :  { %v5925_v27 = vld [vmem:[#allocation5 + $0x120] ss:$28 sps:$4 sm:$0xff]   ;;  %v5952_v46 = vld [vmem:[#allocation5 + $0xa48] ss:$28 sps:$4 sm:$0xff]   ;;  %s6811_s16 = scalar_lea.vmem %s5058_s6, 128 }
  0x78   :  { %2341 = vmatpush1.bf16.msra.mxu0 %v5854_v30  ;;  %v5936_v30 = vld [vmem:[#allocation5 + $0x774] ss:$28 sps:$4 sm:$0xff]   ;;  %v5955_v50 = vld [vmem:[#allocation5 + $0x8] ss:$28 sps:$4 sm:$0xff]   ;;  %p6812_p7 = scmp.ne.s32.totalorder %s5058_s6, %s6811_s16  ;;  %p6817_p9 = scmp.lt.s32.totalorder %s6811_s16, %s6811_s16 }
  0x79   :  { %2382 = vmatpush1.bf16.msra.mxu1 %v5855_v31  ;;  %2342 = vmatprep.subr.bf16.mxu0 %v5856_v32  ;;  %v5931_v31 = vld [vmem:[#allocation5 + $0xe8] ss:$28 sps:$4 sm:$0xff]   ;;  %v5934_v32 = vld [vmem:[#allocation5 + $0x770] ss:$28 sps:$4 sm:$0xff]  }
  0x7a   :  { %2383 = vmatprep.subr.bf16.mxu1 %v5858_v33  ;;  %v5939_v33 = vld [vmem:[#allocation5 + $0xb4] ss:$28 sps:$4 sm:$0xff]   ;;  %v5999_v15 = vld [vmem:[#allocation5 + $0x204] ss:$28 sps:$4 sm:$0xff]   ;;  %p6818_p10 = por %p6817_p9, %p6816_p8 }
  0x7c   :  { %2343 = vmatpush2.bf16.msra.mxu0 %v5860_v34  ;;  %v5942_v34 = vld [vmem:[#allocation5 + $0x73c] ss:$28 sps:$4 sm:$0xff]   ;;  %p6819_p11 = pnand %p6818_p10, %p6812_p7 }
  0x7d   :  { %2384 = vmatpush2.bf16.msra.mxu1 %v5861_v35  ;;  %2344 = vmatprep.subr.bf16.mxu0 %v5862_v36  ;;  %v120_v35 = vld [vmem:[#allocation2 + $0x28] sm:$0xff] }
  0x7e   :  { %2385 = vmatprep.subr.bf16.mxu1 %v5864_v37  ;;  %v6937_v36 = vpack.c.bf16 %v120_v35, %v120_v35  ;;  %v5937_v37 = vld [vmem:[#allocation5 + $0xb0] ss:$28 sps:$4 sm:$0xff]   ;;  %v6023_v35 = vld [vmem:[#allocation5 + $0x824] ss:$28 sps:$4 sm:$0xff]  }
  0x80   :  { %2345 = vmatpush2.bf16.msra.mxu0 %v5866_v38  ;;  %v5940_v38 = vld [vmem:[#allocation5 + $0x738] ss:$28 sps:$4 sm:$0xff]  }
  0x81   :  { %2386 = vmatpush2.bf16.msra.mxu1 %v5867_v39  ;;  %2346 = vmatprep.subr.bf16.mxu0 %v5868_v40  ;;  %v5945_v39 = vld [vmem:[#allocation5 + $0x7c] ss:$28 sps:$4 sm:$0xff]   ;;  %v5948_v40 = vld [vmem:[#allocation5 + $0x704] ss:$28 sps:$4 sm:$0xff]  }
  0x82   :  { %2387 = vmatprep.subr.bf16.mxu1 %v5870_v41  ;;  %v5943_v41 = vld [vmem:[#allocation5 + $0x78] ss:$28 sps:$4 sm:$0xff]  }
  0x84   :  { %2347 = vmatpush2.bf16.msra.mxu0 %v5872_v42  ;;  %v5946_v42 = vld [vmem:[#allocation5 + $0x700] ss:$28 sps:$4 sm:$0xff]  }
  0x85   :  { %2388 = vmatpush2.bf16.msra.mxu1 %v5873_v43  ;;  %2348 = vmatprep.subr.bf16.mxu0 %v5874_v44  ;;  %v5951_v43 = vld [vmem:[#allocation5 + $0x44] ss:$28 sps:$4 sm:$0xff]   ;;  %v5954_v44 = vld [vmem:[#allocation5 + $0xa4c] ss:$28 sps:$4 sm:$0xff]  }
  0x86   :  { %2389 = vmatprep.subr.bf16.mxu1 %v5876_v45  ;;  %v5949_v45 = vld [vmem:[#allocation5 + $0x40] ss:$28 sps:$4 sm:$0xff]  }
  0x88   :  { %2349 = vmatpush2.bf16.msra.mxu0 %v5878_v47  ;;  %v5957_v47 = vld [vmem:[#allocation5 + $0xc] ss:$28 sps:$4 sm:$0xff]  }
  0x89   :  { %2390 = vmatpush2.bf16.msra.mxu1 %v5879_v48  ;;  %2350 = vmatprep.subr.bf16.mxu0 %v5880_v51  ;;  %v5960_v48 = vld [vmem:[#allocation5 + $0xa14] ss:$28 sps:$4 sm:$0xff]  }
  0x8a   :  { %2391 = vmatprep.subr.bf16.mxu1 %v5882_v53  ;;  %v5958_v51 = vld [vmem:[#allocation5 + $0xa10] ss:$28 sps:$4 sm:$0xff]  }
  0x8b   :  { %v5963_v53 = vld [vmem:[#allocation5 + $0x354] ss:$28 sps:$4 sm:$0xff]  }
  0x8c   :  { %2351 = vmatpush2.bf16.msra.mxu0 %v5884_v54  ;;  %v5966_v54 = vld [vmem:[#allocation5 + $0x9dc] ss:$28 sps:$4 sm:$0xff]  }
  0x8d   :  { %2392 = vmatpush2.bf16.msra.mxu1 %v5885_v55  ;;  %2352 = vmatprep.subr.bf16.mxu0 %v5886_v56  ;;  %v5961_v55 = vld [vmem:[#allocation5 + $0x350] ss:$28 sps:$4 sm:$0xff]   ;;  %v5964_v56 = vld [vmem:[#allocation5 + $0x9d8] ss:$28 sps:$4 sm:$0xff]  }
  0x8e   :  { %2393 = vmatprep.subr.bf16.mxu1 %v5888_v57  ;;  %v5969_v57 = vld [vmem:[#allocation5 + $0x31c] ss:$28 sps:$4 sm:$0xff]  }
  0x90   :  { %2353 = vmatpush2.bf16.msra.mxu0 %v5890_v58  ;;  %v5972_v58 = vld [vmem:[#allocation5 + $0x9a4] ss:$28 sps:$4 sm:$0xff]  }
  0x91   :  { %2394 = vmatpush2.bf16.msra.mxu1 %v5891_v59  ;;  %2354 = vmatprep.subr.bf16.mxu0 %v5892_v60  ;;  %v5967_v59 = vld [vmem:[#allocation5 + $0x318] ss:$28 sps:$4 sm:$0xff]   ;;  %v5970_v60 = vld [vmem:[#allocation5 + $0x9a0] ss:$28 sps:$4 sm:$0xff]  }
  0x92   :  { %2395 = vmatprep.subr.bf16.mxu1 %v5894_v61  ;;  %v5975_v61 = vld [vmem:[#allocation5 + $0x2e4] ss:$28 sps:$4 sm:$0xff]  }
  0x94   :  { %2355 = vmatpush2.bf16.msra.mxu0 %v5896_v62  ;;  %v5978_v62 = vld [vmem:[#allocation5 + $0x96c] ss:$28 sps:$4 sm:$0xff]  }
  0x95   :  { %2396 = vmatpush2.bf16.msra.mxu1 %v5897_v63  ;;  %2356 = vmatprep.subr.bf16.mxu0 %v5898_v0  ;;  %v5973_v63 = vld [vmem:[#allocation5 + $0x2e0] ss:$28 sps:$4 sm:$0xff]   ;;  %v5976_v0 = vld [vmem:[#allocation5 + $0x968] ss:$28 sps:$4 sm:$0xff]  }
  0x96   :  { %2397 = vmatprep.subr.bf16.mxu1 %v5900_v1  ;;  %v5981_v1 = vld [vmem:[#allocation5 + $0x2ac] ss:$28 sps:$4 sm:$0xff]  }
  0x98   :  { %2357 = vmatpush2.bf16.msra.mxu0 %v5902_v2  ;;  %v5984_v2 = vld [vmem:[#allocation5 + $0x934] ss:$28 sps:$4 sm:$0xff]  }
  0x99   :  { %2398 = vmatpush2.bf16.msra.mxu1 %v5903_v3  ;;  %2408 = vmatprep.subr.bf16.mxu0 %v5906_v6  ;;  %v5979_v3 = vld [vmem:[#allocation5 + $0x2a8] ss:$28 sps:$4 sm:$0xff]   ;;  %v5990_v6 = vld [vmem:[#allocation5 + $0x8fc] ss:$28 sps:$4 sm:$0xff]  }
  0x9a   :  { %2463 = vmatprep.subr.bf16.mxu1 %v5909_v7  ;;  %v5985_v7 = vld [vmem:[#allocation5 + $0x270] ss:$28 sps:$4 sm:$0xff]  }
  0x9b   :  { %2359 = vmatmul.mubr.bf16.vlgmr.msra.gmra.mxu0 %v6925_v8 }
  0x9c   :  { %2400 = vmatmul.mubr.bf16.vlgmr.msra.gmra.mxu1 %v6927_v9  ;;  %2409 = vmatpush1.bf16.msra.mxu0 %v5904_v10  ;;  %v5988_v10 = vld [vmem:[#allocation5 + $0x8f8] ss:$28 sps:$4 sm:$0xff]  }
  0x9d   :  { %2464 = vmatpush1.bf16.msra.mxu1 %v5907_v11  ;;  %2410 = vmatprep.subr.bf16.mxu0 %v5912_v12  ;;  %v5993_v11 = vld [vmem:[#allocation5 + $0x23c] ss:$28 sps:$4 sm:$0xff]   ;;  %v5996_v12 = vld [vmem:[#allocation5 + $0x8c4] ss:$28 sps:$4 sm:$0xff]  }
  0x9e   :  { %2481 = vmatprep.mubr.bf16.mxu1 %v6854_v16  ;;  %2490 = vmatprep.subr.bf16.mxu1 %v5915_v13  ;;  %v5991_v13 = vld [vmem:[#allocation5 + $0x238] ss:$28 sps:$4 sm:$0xff]  }
  0x9f   :  { %2440 = vmatprep.mubr.bf16.mxu0 %v6937_v36 }
  0xa0   :  { %2411 = vmatpush1.bf16.msra.mxu0 %v5910_v14  ;;  %v5994_v14 = vld [vmem:[#allocation5 + $0x8c0] ss:$28 sps:$4 sm:$0xff]  }
  0xa1   :  { %2412 = vmatprep.subr.bf16.mxu0 %v5918_v17  ;;  %v119_v17 = vld [vmem:[#allocation2 + $0x20] sm:$0xff] }
  0xa4   :  { %5412 = vmatmul.mubr.msk.bf16.vlgmr.msra.gmra.mxu1 %vm2322_vm0, %v6932_v19  ;;  %2413 = vmatpush1.bf16.msra.mxu0 %v5916_v20  ;;  %v5997_v20 = vld [vmem:[#allocation5 + $0x200] ss:$28 sps:$4 sm:$0xff]  }
  0xa5   :  { %2491 = vmatpush1.bf16.msra.mxu1 %v5913_v18  ;;  %2414 = vmatprep.subr.bf16.mxu0 %v5924_v22  ;;  %v6002_v18 = vld [vmem:[#allocation5 + $0x514] ss:$28 sps:$4 sm:$0xff]  }
  0xa6   :  { %2492 = vmatprep.subr.bf16.mxu1 %v5921_v21  ;;  %2522 = vmatprep.mubr.bf16.mxu1 %v6919_v49  ;;  %v6940_v21 = vpack.c.bf16 %v119_v17, %v119_v17  ;;  %v6000_v22 = vld [vmem:[#allocation5 + $0x510] ss:$28 sps:$4 sm:$0xff]  }
  0xa7   :  { %v6083_v17 = vld [vmem:[#allocation5 + $0x974] ss:$28 sps:$4 sm:$0xff]  }
  0xa8   :  { %2415 = vmatpush1.bf16.msra.mxu0 %v5922_v24  ;;  %v6008_v24 = vld [vmem:[#allocation5 + $0x4dc] ss:$28 sps:$4 sm:$0xff]  }
  0xa9   :  { %2493 = vmatpush1.bf16.msra.mxu1 %v5919_v23  ;;  %2416 = vmatprep.subr.bf16.mxu0 %v5930_v26  ;;  %v6005_v23 = vld [vmem:[#allocation5 + $0x1cc] ss:$28 sps:$4 sm:$0xff]   ;;  %v6006_v26 = vld [vmem:[#allocation5 + $0x4d8] ss:$28 sps:$4 sm:$0xff]  }
  0xaa   :  { %2494 = vmatprep.subr.bf16.mxu1 %v5927_v25  ;;  %v6003_v25 = vld [vmem:[#allocation5 + $0x1c8] ss:$28 sps:$4 sm:$0xff]  }
  0xac   :  { %2417 = vmatpush1.bf16.msra.mxu0 %v5928_v28  ;;  %v6014_v28 = vld [vmem:[#allocation5 + $0x4a4] ss:$28 sps:$4 sm:$0xff]  }
  0xad   :  { %2495 = vmatpush1.bf16.msra.mxu1 %v5925_v27  ;;  %2418 = vmatprep.subr.bf16.mxu0 %v5936_v30  ;;  %v6011_v27 = vld [vmem:[#allocation5 + $0x894] ss:$28 sps:$4 sm:$0xff]   ;;  %v6012_v30 = vld [vmem:[#allocation5 + $0x4a0] ss:$28 sps:$4 sm:$0xff]  }
  0xae   :  { %2496 = vmatprep.subr.bf16.mxu1 %v5933_v29  ;;  %v6009_v29 = vld [vmem:[#allocation5 + $0x890] ss:$28 sps:$4 sm:$0xff]  }
  0xb0   :  { %2419 = vmatpush1.bf16.msra.mxu0 %v5934_v32  ;;  %v6020_v32 = vld [vmem:[#allocation5 + $0x46c] ss:$28 sps:$4 sm:$0xff]  }
  0xb1   :  { %2497 = vmatpush1.bf16.msra.mxu1 %v5931_v31  ;;  %2420 = vmatprep.subr.bf16.mxu0 %v5942_v34  ;;  %v6017_v31 = vld [vmem:[#allocation5 + $0x85c] ss:$28 sps:$4 sm:$0xff]   ;;  %v6018_v34 = vld [vmem:[#allocation5 + $0x468] ss:$28 sps:$4 sm:$0xff]  }
  0xb2   :  { %2498 = vmatprep.subr.bf16.mxu1 %v5939_v33  ;;  %v6015_v33 = vld [vmem:[#allocation5 + $0x858] ss:$28 sps:$4 sm:$0xff]  }
  0xb4   :  { %2421 = vmatpush1.bf16.msra.mxu0 %v5940_v38  ;;  %v6021_v38 = vld [vmem:[#allocation5 + $0x820] ss:$28 sps:$4 sm:$0xff]  }
  0xb5   :  { %2499 = vmatpush1.bf16.msra.mxu1 %v5937_v37  ;;  %2422 = vmatprep.subr.bf16.mxu0 %v5948_v40  ;;  %v6026_v37 = vld [vmem:[#allocation5 + $0x434] ss:$28 sps:$4 sm:$0xff]   ;;  %v6029_v40 = vld [vmem:[#allocation5 + $0x7ec] ss:$28 sps:$4 sm:$0xff]  }
  0xb6   :  { %2500 = vmatprep.subr.bf16.mxu1 %v5945_v39  ;;  %v6024_v39 = vld [vmem:[#allocation5 + $0x430] ss:$28 sps:$4 sm:$0xff]  }
  0xb8   :  { %2423 = vmatpush1.bf16.msra.mxu0 %v5946_v42  ;;  %v6027_v42 = vld [vmem:[#allocation5 + $0x7e8] ss:$28 sps:$4 sm:$0xff]  }
  0xb9   :  { %2501 = vmatpush1.bf16.msra.mxu1 %v5943_v41  ;;  %2424 = vmatprep.subr.bf16.mxu0 %v5954_v44  ;;  %v6032_v41 = vld [vmem:[#allocation5 + $0x3fc] ss:$28 sps:$4 sm:$0xff]   ;;  %v6035_v44 = vld [vmem:[#allocation5 + $0x7b4] ss:$28 sps:$4 sm:$0xff]  }
  0xba   :  { %2502 = vmatprep.subr.bf16.mxu1 %v5951_v43  ;;  %v6030_v43 = vld [vmem:[#allocation5 + $0x3f8] ss:$28 sps:$4 sm:$0xff]  }
  0xbc   :  { %2425 = vmatpush2.bf16.msra.mxu0 %v5952_v46  ;;  %v6033_v46 = vld [vmem:[#allocation5 + $0x7b0] ss:$28 sps:$4 sm:$0xff]  }
  0xbd   :  { %2503 = vmatpush1.bf16.msra.mxu1 %v5949_v45  ;;  %2426 = vmatprep.subr.bf16.mxu0 %v5960_v48  ;;  %v6038_v45 = vld [vmem:[#allocation5 + $0x3c4] ss:$28 sps:$4 sm:$0xff]   ;;  %v6041_v48 = vld [vmem:[#allocation5 + $0x77c] ss:$28 sps:$4 sm:$0xff]  }
  0xbe   :  { %2504 = vmatprep.subr.bf16.mxu1 %v5957_v47  ;;  %v6036_v47 = vld [vmem:[#allocation5 + $0x3c0] ss:$28 sps:$4 sm:$0xff]  }
  0xc0   :  { %2427 = vmatpush2.bf16.msra.mxu0 %v5958_v51  ;;  %v6039_v51 = vld [vmem:[#allocation5 + $0x778] ss:$28 sps:$4 sm:$0xff]  }
  0xc1   :  { %2505 = vmatpush1.bf16.msra.mxu1 %v5955_v50  ;;  %2428 = vmatprep.subr.bf16.mxu0 %v5966_v54  ;;  %v6044_v50 = vld [vmem:[#allocation5 + $0x38c] ss:$28 sps:$4 sm:$0xff]   ;;  %v6047_v54 = vld [vmem:[#allocation5 + $0x744] ss:$28 sps:$4 sm:$0xff]  }
  0xc2   :  { %2506 = vmatprep.subr.bf16.mxu1 %v5963_v53  ;;  %v6042_v53 = vld [vmem:[#allocation5 + $0x388] ss:$28 sps:$4 sm:$0xff]  }
  0xc4   :  { %2429 = vmatpush2.bf16.msra.mxu0 %v5964_v56  ;;  %v6045_v56 = vld [vmem:[#allocation5 + $0x740] ss:$28 sps:$4 sm:$0xff]  }
  0xc5   :  { %2507 = vmatpush2.bf16.msra.mxu1 %v5961_v55  ;;  %2430 = vmatprep.subr.bf16.mxu0 %v5972_v58  ;;  %v6050_v55 = vld [vmem:[#allocation5 + $0x6d4] ss:$28 sps:$4 sm:$0xff]   ;;  %v6053_v58 = vld [vmem:[#allocation5 + $0x70c] ss:$28 sps:$4 sm:$0xff]  }
  0xc6   :  { %2508 = vmatprep.subr.bf16.mxu1 %v5969_v57  ;;  %v6048_v57 = vld [vmem:[#allocation5 + $0x6d0] ss:$28 sps:$4 sm:$0xff]  }
  0xc8   :  { %2431 = vmatpush2.bf16.msra.mxu0 %v5970_v60  ;;  %v6051_v60 = vld [vmem:[#allocation5 + $0x708] ss:$28 sps:$4 sm:$0xff]  }
  0xc9   :  { %2509 = vmatpush2.bf16.msra.mxu1 %v5967_v59  ;;  %2432 = vmatprep.subr.bf16.mxu0 %v5978_v62  ;;  %v6056_v59 = vld [vmem:[#allocation5 + $0x69c] ss:$28 sps:$4 sm:$0xff]   ;;  %v6059_v62 = vld [vmem:[#allocation5 + $0xa54] ss:$28 sps:$4 sm:$0xff]  }
  0xca   :  { %2510 = vmatprep.subr.bf16.mxu1 %v5975_v61  ;;  %v6054_v61 = vld [vmem:[#allocation5 + $0x698] ss:$28 sps:$4 sm:$0xff]  }
  0xcc   :  { %2433 = vmatpush2.bf16.msra.mxu0 %v5976_v0  ;;  %v6057_v0 = vld [vmem:[#allocation5 + $0xa50] ss:$28 sps:$4 sm:$0xff]  }
  0xcd   :  { %2511 = vmatpush2.bf16.msra.mxu1 %v5973_v63  ;;  %2434 = vmatprep.subr.bf16.mxu0 %v5984_v2  ;;  %v6062_v63 = vld [vmem:[#allocation5 + $0x664] ss:$28 sps:$4 sm:$0xff]   ;;  %v6065_v2 = vld [vmem:[#allocation5 + $0xa1c] ss:$28 sps:$4 sm:$0xff]  }
  0xce   :  { %2512 = vmatprep.subr.bf16.mxu1 %v5981_v1  ;;  %v6060_v1 = vld [vmem:[#allocation5 + $0x660] ss:$28 sps:$4 sm:$0xff]  }
  0xd0   :  { %2435 = vmatpush2.bf16.msra.mxu0 %v5982_v4  ;;  %v6063_v4 = vld [vmem:[#allocation5 + $0xa18] ss:$28 sps:$4 sm:$0xff]  }
  0xd1   :  { %2513 = vmatpush2.bf16.msra.mxu1 %v5979_v3  ;;  %2436 = vmatprep.subr.bf16.mxu0 %v5990_v6  ;;  %v6068_v3 = vld [vmem:[#allocation5 + $0x62c] ss:$28 sps:$4 sm:$0xff]   ;;  %v6071_v6 = vld [vmem:[#allocation5 + $0x9e4] ss:$28 sps:$4 sm:$0xff]  }
  0xd2   :  { %2514 = vmatprep.subr.bf16.mxu1 %v5987_v5  ;;  %v6066_v5 = vld [vmem:[#allocation5 + $0x628] ss:$28 sps:$4 sm:$0xff]  }
  0xd4   :  { %2437 = vmatpush2.bf16.msra.mxu0 %v5988_v10  ;;  %v6069_v10 = vld [vmem:[#allocation5 + $0x9e0] ss:$28 sps:$4 sm:$0xff]  }
  0xd5   :  { %2515 = vmatpush2.bf16.msra.mxu1 %v5985_v7  ;;  %2438 = vmatprep.subr.bf16.mxu0 %v5996_v12  ;;  %v6074_v7 = vld [vmem:[#allocation5 + $0x5f4] ss:$28 sps:$4 sm:$0xff]   ;;  %v6077_v12 = vld [vmem:[#allocation5 + $0x9ac] ss:$28 sps:$4 sm:$0xff]  }
  0xd6   :  { %2516 = vmatprep.subr.bf16.mxu1 %v5993_v11  ;;  %v6072_v11 = vld [vmem:[#allocation5 + $0x5f0] ss:$28 sps:$4 sm:$0xff]  }
  0xd8   :  { %2439 = vmatpush2.bf16.msra.mxu0 %v5994_v14  ;;  %v6075_v14 = vld [vmem:[#allocation5 + $0x9a8] ss:$28 sps:$4 sm:$0xff]  }
  0xd9   :  { %2517 = vmatpush2.bf16.msra.mxu1 %v5991_v13  ;;  %2531 = vmatprep.subr.bf16.mxu0 %v6002_v18  ;;  %v6080_v13 = vld [vmem:[#allocation5 + $0x5bc] ss:$28 sps:$4 sm:$0xff]   ;;  %v6086_v18 = vld [vmem:[#allocation5 + $0x584] ss:$28 sps:$4 sm:$0xff]  }
  0xda   :  { %2518 = vmatprep.subr.bf16.mxu1 %v5999_v15  ;;  %v6078_v15 = vld [vmem:[#allocation5 + $0x5b8] ss:$28 sps:$4 sm:$0xff]  }
  0xdb   :  { %2441 = vmatmul.mubr.bf16.vlgmr.msra.gmra.mxu0 %v6940_v21 }
  0xdc   :  { %2532 = vmatpush1.bf16.msra.mxu0 %v6000_v22  ;;  %2563 = vmatprep.mubr.bf16.mxu0 %v6921_v52  ;;  %v6084_v22 = vld [vmem:[#allocation5 + $0x580] ss:$28 sps:$4 sm:$0xff]  }
  0xdd   :  { %2519 = vmatpush2.bf16.msra.mxu1 %v5997_v20  ;;  %2533 = vmatprep.subr.bf16.mxu0 %v6008_v24  ;;  %v6081_v20 = vld [vmem:[#allocation5 + $0x970] ss:$28 sps:$4 sm:$0xff]  }
  0xde   :  { %2520 = vmatprep.subr.bf16.mxu1 %v6005_v23  ;;  %v6089_v23 = vld [vmem:[#allocation5 + $0x93c] ss:$28 sps:$4 sm:$0xff]   ;;  %v6092_v24 = vld [vmem:[#allocation5 + $0x54c] ss:$28 sps:$4 sm:$0xff]  }
  0xe0   :  { %2534 = vmatpush1.bf16.msra.mxu0 %v6006_v26  ;;  %v6090_v26 = vld [vmem:[#allocation5 + $0x548] ss:$28 sps:$4 sm:$0xff]  }
  0xe1   :  { %2521 = vmatpush2.bf16.msra.mxu1 %v6003_v25  ;;  %2535 = vmatprep.subr.bf16.mxu0 %v6014_v28  ;;  %v6087_v25 = vld [vmem:[#allocation5 + $0x938] ss:$28 sps:$4 sm:$0xff]  }
  0xe2   :  { %2572 = vmatprep.subr.bf16.mxu1 %v6011_v27  ;;  %v6095_v27 = vld [vmem:[#allocation5 + $0x904] ss:$28 sps:$4 sm:$0xff]   ;;  %v6098_v28 = vld [vmem:[#allocation5 + $0x19c] ss:$28 sps:$4 sm:$0xff]  }
  0xe4   :  { %2523 = vmatmul.mubr.bf16.vlgmr.msra.gmra.mxu1 %v6925_v8  ;;  %2536 = vmatpush1.bf16.msra.mxu0 %v6012_v30  ;;  %v6096_v30 = vld [vmem:[#allocation5 + $0x198] ss:$28 sps:$4 sm:$0xff]  }
  0xe5   :  { %2573 = vmatpush1.bf16.msra.mxu1 %v6009_v29  ;;  %2537 = vmatprep.subr.bf16.mxu0 %v6020_v32  ;;  %v6093_v29 = vld [vmem:[#allocation5 + $0x900] ss:$28 sps:$4 sm:$0xff]  }
  0xe6   :  { %2574 = vmatprep.subr.bf16.mxu1 %v6017_v31  ;;  %2604 = vmatprep.mubr.bf16.mxu1 %v6937_v36  ;;  %v6101_v31 = vld [vmem:[#allocation5 + $0x8cc] ss:$28 sps:$4 sm:$0xff]   ;;  %v6104_v32 = vld [vmem:[#allocation5 + $0x164] ss:$28 sps:$4 sm:$0xff]  }
  0xe8   :  { %2538 = vmatpush1.bf16.msra.mxu0 %v6018_v34  ;;  %v6102_v34 = vld [vmem:[#allocation5 + $0x160] ss:$28 sps:$4 sm:$0xff]  }
  0xe9   :  { %2575 = vmatpush1.bf16.msra.mxu1 %v6015_v33  ;;  %2539 = vmatprep.subr.bf16.mxu0 %v6026_v37  ;;  %v6099_v33 = vld [vmem:[#allocation5 + $0x8c8] ss:$28 sps:$4 sm:$0xff]  }
  0xea   :  { %2576 = vmatprep.subr.bf16.mxu1 %v6023_v35  ;;  %v6107_v35 = vld [vmem:[#allocation5 + $0x12c] ss:$28 sps:$4 sm:$0xff]  }
  0xeb   :  { %v6110_v37 = vld [vmem:[#allocation5 + $0xa8c] ss:$28 sps:$4 sm:$0xff]  }
  0xec   :  { %2540 = vmatpush1.bf16.msra.mxu0 %v6024_v39  ;;  %v6108_v39 = vld [vmem:[#allocation5 + $0xa88] ss:$28 sps:$4 sm:$0xff]  }
  0xed   :  { %2577 = vmatpush1.bf16.msra.mxu1 %v6021_v38  ;;  %2541 = vmatprep.subr.bf16.mxu0 %v6032_v41  ;;  %v6105_v38 = vld [vmem:[#allocation5 + $0x128] ss:$28 sps:$4 sm:$0xff]   ;;  %v6116_v41 = vld [vmem:[#allocation5 + $0x51c] ss:$28 sps:$4 sm:$0xff]  }
  0xee   :  { %2578 = vmatprep.subr.bf16.mxu1 %v6029_v40  ;;  %v6113_v40 = vld [vmem:[#allocation5 + $0xf4] ss:$28 sps:$4 sm:$0xff]  }
  0xf0   :  { %2542 = vmatpush1.bf16.msra.mxu0 %v6030_v43  ;;  %v6119_v43 = vld [vmem:[#allocation5 + $0xbc] ss:$28 sps:$4 sm:$0xff]  }
  0xf1   :  { %2579 = vmatpush1.bf16.msra.mxu1 %v6027_v42  ;;  %2543 = vmatprep.subr.bf16.mxu0 %v6038_v45  ;;  %v6111_v42 = vld [vmem:[#allocation5 + $0xf0] ss:$28 sps:$4 sm:$0xff]   ;;  %v6117_v45 = vld [vmem:[#allocation5 + $0xb8] ss:$28 sps:$4 sm:$0xff]  }
  0xf2   :  { %2580 = vmatprep.subr.bf16.mxu1 %v6035_v44  ;;  %v6114_v44 = vld [vmem:[#allocation5 + $0x518] ss:$28 sps:$4 sm:$0xff]  }
  0xf4   :  { %2544 = vmatpush1.bf16.msra.mxu0 %v6036_v47  ;;  %v6125_v47 = vld [vmem:[#allocation5 + $0x84] ss:$28 sps:$4 sm:$0xff]  }
  0xf5   :  { %2581 = vmatpush1.bf16.msra.mxu1 %v6033_v46  ;;  %2545 = vmatprep.subr.bf16.mxu0 %v6044_v50  ;;  %v6122_v46 = vld [vmem:[#allocation5 + $0x4e4] ss:$28 sps:$4 sm:$0xff]  }
  0xf6   :  { %2582 = vmatprep.subr.bf16.mxu1 %v6041_v48  ;;  %v6120_v48 = vld [vmem:[#allocation5 + $0x4e0] ss:$28 sps:$4 sm:$0xff]  }
  0xf7   :  { %v6123_v50 = vld [vmem:[#allocation5 + $0x80] ss:$28 sps:$4 sm:$0xff]  }
  0xf8   :  { %2546 = vmatpush1.bf16.msra.mxu0 %v6042_v53  ;;  %v6131_v53 = vld [vmem:[#allocation5 + $0x4c] ss:$28 sps:$4 sm:$0xff]  }
  0xf9   :  { %2583 = vmatpush1.bf16.msra.mxu1 %v6039_v51  ;;  %2547 = vmatprep.subr.bf16.mxu0 %v6050_v55  ;;  %v6128_v51 = vld [vmem:[#allocation5 + $0x4ac] ss:$28 sps:$4 sm:$0xff]  }
  0xfa   :  { %2584 = vmatprep.subr.bf16.mxu1 %v6047_v54  ;;  %v6126_v54 = vld [vmem:[#allocation5 + $0x4a8] ss:$28 sps:$4 sm:$0xff]  }
  0xfb   :  { %v6129_v55 = vld [vmem:[#allocation5 + $0x48] ss:$28 sps:$4 sm:$0xff]  }
  0xfc   :  { %2548 = vmatpush2.bf16.msra.mxu0 %v6048_v57  ;;  %v6137_v57 = vld [vmem:[#allocation5 + $0x14] ss:$28 sps:$4 sm:$0xff]  }
  0xfd   :  { %2585 = vmatpush1.bf16.msra.mxu1 %v6045_v56  ;;  %2549 = vmatprep.subr.bf16.mxu0 %v6056_v59  ;;  %v6134_v56 = vld [vmem:[#allocation5 + $0x474] ss:$28 sps:$4 sm:$0xff]  }
  0xfe   :  { %2586 = vmatprep.subr.bf16.mxu1 %v6053_v58  ;;  %v6132_v58 = vld [vmem:[#allocation5 + $0x470] ss:$28 sps:$4 sm:$0xff]  }
  0xff   :  { %v6135_v59 = vld [vmem:[#allocation5 + $0x10] ss:$28 sps:$4 sm:$0xff]  }
 0x100   :  { %2550 = vmatpush2.bf16.msra.mxu0 %v6054_v61  ;;  %v6143_v61 = vld [vmem:[#allocation5 + $0x35c] ss:$28 sps:$4 sm:$0xff]  }
 0x101   :  { %2587 = vmatpush1.bf16.msra.mxu1 %v6051_v60  ;;  %2551 = vmatprep.subr.bf16.mxu0 %v6062_v63  ;;  %v6140_v60 = vld [vmem:[#allocation5 + $0x43c] ss:$28 sps:$4 sm:$0xff]  }
 0x102   :  { %2588 = vmatprep.subr.bf16.mxu1 %v6059_v62  ;;  %v6138_v62 = vld [vmem:[#allocation5 + $0x438] ss:$28 sps:$4 sm:$0xff]  }
 0x103   :  { %v6141_v63 = vld [vmem:[#allocation5 + $0x358] ss:$28 sps:$4 sm:$0xff]  }
 0x104   :  { %2552 = vmatpush2.bf16.msra.mxu0 %v6060_v1  ;;  %v6149_v1 = vld [vmem:[#allocation5 + $0x324] ss:$28 sps:$4 sm:$0xff]  }
 0x105   :  { %2589 = vmatpush2.bf16.msra.mxu1 %v6057_v0  ;;  %2553 = vmatprep.subr.bf16.mxu0 %v6068_v3  ;;  %v6146_v0 = vld [vmem:[#allocation5 + $0x404] ss:$28 sps:$4 sm:$0xff]  }
 0x106   :  { %2590 = vmatprep.subr.bf16.mxu1 %v6065_v2  ;;  %v6144_v2 = vld [vmem:[#allocation5 + $0x400] ss:$28 sps:$4 sm:$0xff]  }
 0x107   :  { %v6147_v3 = vld [vmem:[#allocation5 + $0x320] ss:$28 sps:$4 sm:$0xff]  }
 0x108   :  { %2554 = vmatpush2.bf16.msra.mxu0 %v6066_v5  ;;  %v6155_v5 = vld [vmem:[#allocation5 + $0x2ec] ss:$28 sps:$4 sm:$0xff]  }
 0x109   :  { %2591 = vmatpush2.bf16.msra.mxu1 %v6063_v4  ;;  %2555 = vmatprep.subr.bf16.mxu0 %v6074_v7  ;;  %v6152_v4 = vld [vmem:[#allocation5 + $0x3cc] ss:$28 sps:$4 sm:$0xff]  }
 0x10a   :  { %2592 = vmatprep.subr.bf16.mxu1 %v6071_v6  ;;  %v6150_v6 = vld [vmem:[#allocation5 + $0x3c8] ss:$28 sps:$4 sm:$0xff]  }
 0x10b   :  { %v6153_v7 = vld [vmem:[#allocation5 + $0x2e8] ss:$28 sps:$4 sm:$0xff]  }
 0x10c   :  { %2556 = vmatpush2.bf16.msra.mxu0 %v6072_v11  ;;  %v6161_v11 = vld [vmem:[#allocation5 + $0x2b4] ss:$28 sps:$4 sm:$0xff]  }
 0x10d   :  { %2593 = vmatpush2.bf16.msra.mxu1 %v6069_v10  ;;  %2557 = vmatprep.subr.bf16.mxu0 %v6080_v13  ;;  %v6158_v10 = vld [vmem:[#allocation5 + $0x394] ss:$28 sps:$4 sm:$0xff]  }
 0x10e   :  { %2594 = vmatprep.subr.bf16.mxu1 %v6077_v12  ;;  %v6156_v12 = vld [vmem:[#allocation5 + $0x390] ss:$28 sps:$4 sm:$0xff]  }
 0x10f   :  { %v6159_v13 = vld [vmem:[#allocation5 + $0x2b0] ss:$28 sps:$4 sm:$0xff]  }
 0x110   :  { %2558 = vmatpush2.bf16.msra.mxu0 %v6078_v15  ;;  %v6167_v15 = vld [vmem:[#allocation5 + $0x27c] ss:$28 sps:$4 sm:$0xff]  }
 0x111   :  { %2595 = vmatpush2.bf16.msra.mxu1 %v6075_v14  ;;  %2559 = vmatprep.subr.bf16.mxu0 %v6086_v18  ;;  %v6164_v14 = vld [vmem:[#allocation5 + $0x6dc] ss:$28 sps:$4 sm:$0xff]  }
 0x112   :  { %2596 = vmatprep.subr.bf16.mxu1 %v6083_v17  ;;  %v6162_v17 = vld [vmem:[#allocation5 + $0x6d8] ss:$28 sps:$4 sm:$0xff]  }
 0x113   :  { %v6165_v18 = vld [vmem:[#allocation5 + $0x278] ss:$28 sps:$4 sm:$0xff]  }
 0x114   :  { %2560 = vmatpush2.bf16.msra.mxu0 %v6084_v22  ;;  %v6173_v22 = vld [vmem:[#allocation5 + $0x244] ss:$28 sps:$4 sm:$0xff]  }
 0x115   :  { %2597 = vmatpush2.bf16.msra.mxu1 %v6081_v20  ;;  %2561 = vmatprep.subr.bf16.mxu0 %v6092_v24  ;;  %v6170_v20 = vld [vmem:[#allocation5 + $0x6a4] ss:$28 sps:$4 sm:$0xff]  }
 0x116   :  { %2598 = vmatprep.subr.bf16.mxu1 %v6089_v23  ;;  %v6168_v23 = vld [vmem:[#allocation5 + $0x6a0] ss:$28 sps:$4 sm:$0xff]  }
 0x117   :  { %v6171_v24 = vld [vmem:[#allocation5 + $0x240] ss:$28 sps:$4 sm:$0xff]  }
 0x118   :  { %2562 = vmatpush2.bf16.msra.mxu0 %v6090_v26  ;;  %v6176_v26 = vld [vmem:[#allocation5 + $0x66c] ss:$28 sps:$4 sm:$0xff]  }
 0x119   :  { %2599 = vmatpush2.bf16.msra.mxu1 %v6087_v25  ;;  %2654 = vmatprep.subr.bf16.mxu0 %v6098_v28  ;;  %v523_v25 = vlaneseq  ;;  %v6174_v28 = vld [vmem:[#allocation5 + $0x668] ss:$28 sps:$4 sm:$0xff]  }
 0x11a   :  { %2600 = vmatprep.subr.bf16.mxu1 %v6095_v27  ;;  %v6179_v27 = vld [vmem:[#allocation5 + $0x20c] ss:$28 sps:$4 sm:$0xff]  }
 0x11b   :  { %2564 = vmatmul.mubr.bf16.vlgmr.msra.gmra.mxu0 %v6927_v9 }
 0x11c   :  { %2655 = vmatpush1.bf16.msra.mxu0 %v6096_v30  ;;  %2686 = vmatprep.mubr.bf16.mxu0 %v6919_v49  ;;  %v6954_v30 = vshrl.u32 %v523_v25, 7 }
 0x11d   :  { %2601 = vmatpush2.bf16.msra.mxu1 %v6093_v29  ;;  %2656 = vmatprep.subr.bf16.mxu0 %v6104_v32  ;;  %v6177_v29 = vld [vmem:[#allocation5 + $0x208] ss:$28 sps:$4 sm:$0xff]   ;;  %v6185_v32 = vld [vmem:[#allocation5 + $0x1d4] ss:$28 sps:$4 sm:$0xff]  }
 0x11e   :  { %2602 = vmatprep.subr.bf16.mxu1 %v6101_v31  ;;  %v6182_v31 = vld [vmem:[#allocation5 + $0x634] ss:$28 sps:$4 sm:$0xff]  }
 0x120   :  { %2657 = vmatpush1.bf16.msra.mxu0 %v6102_v34  ;;  %v6183_v34 = vld [vmem:[#allocation5 + $0x1d0] ss:$28 sps:$4 sm:$0xff]  }
 0x121   :  { %2603 = vmatpush2.bf16.msra.mxu1 %v6099_v33  ;;  %2658 = vmatprep.subr.bf16.mxu0 %v6107_v35  ;;  %v6180_v33 = vld [vmem:[#allocation5 + $0x630] ss:$28 sps:$4 sm:$0xff]   ;;  %v6188_v35 = vld [vmem:[#allocation5 + $0x5fc] ss:$28 sps:$4 sm:$0xff]  }
 0x122   :  { %2627 = vmatprep.subr.bf16.mxu1 %v6110_v37  ;;  %v521_v37 = vld [vmem:[#allocation7] sm:$0xff] }
 0x124   :  { %2605 = vmatmul.mubr.bf16.vlgmr.msra.gmra.mxu1 %v6940_v21  ;;  %2659 = vmatpush1.bf16.msra.mxu0 %v6105_v38  ;;  %v525_v38 = vsub.s32 0, %v6954_v30 }
 0x125   :  { %2628 = vmatpush1.bf16.msra.mxu1 %v6108_v39  ;;  %2660 = vmatprep.subr.bf16.mxu0 %v6113_v40  ;;  %v6191_v39 = vld [vmem:[#allocation5 + $0x89c] ss:$28 sps:$4 sm:$0xff]   ;;  %v529_v40 = vsub.s32 1, %v6954_v30 }
 0x126   :  { %2645 = vmatprep.mubr.bf16.mxu1 %v6854_v16  ;;  %2695 = vmatprep.subr.bf16.mxu1 %v6116_v41  ;;  %v6186_v41 = vld [vmem:[#allocation5 + $0x5f8] ss:$28 sps:$4 sm:$0xff]  }
 0x128   :  { %2661 = vmatpush1.bf16.msra.mxu0 %v6111_v42  ;;  %v6189_v42 = vld [vmem:[#allocation5 + $0x898] ss:$28 sps:$4 sm:$0xff]  }
 0x129   :  { %2662 = vmatprep.subr.bf16.mxu0 %v6119_v43  ;;  %v526_v43 = vrot.slane %v521_v37, %v525_v38 }
 0x12c   :  { %5413 = vmatmul.mubr.msk.bf16.vlgmr.msra.gmra.mxu1 %vm2322_vm0, %v6932_v19  ;;  %2663 = vmatpush1.bf16.msra.mxu0 %v6117_v45  ;;  %v6197_v45 = vld [vmem:[#allocation5 + $0x864] ss:$28 sps:$4 sm:$0xff]  }
 0x12d   :  { %2696 = vmatpush1.bf16.msra.mxu1 %v6114_v44  ;;  %2664 = vmatprep.subr.bf16.mxu0 %v6125_v47  ;;  %v6194_v44 = vld [vmem:[#allocation5 + $0x5c4] ss:$28 sps:$4 sm:$0xff]  }
 0x12e   :  { %2697 = vmatprep.subr.bf16.mxu1 %v6122_v46  ;;  %2727 = vmatprep.mubr.bf16.mxu1 %v6921_v52  ;;  %v530_v46 = vrot.slane %v521_v37, %v529_v40  ;;  %v6234_v37 = vld [vmem:[#allocation5 + $0x2b8] ss:$28 sps:$4 sm:$0xff]  }
 0x130   :  { %2665 = vmatpush1.bf16.msra.mxu0 %v6123_v50  ;;  %v6192_v50 = vld [vmem:[#allocation5 + $0x5c0] ss:$28 sps:$4 sm:$0xff]  }
 0x131   :  { %2698 = vmatpush1.bf16.msra.mxu1 %v6120_v48  ;;  %2666 = vmatprep.subr.bf16.mxu0 %v6131_v53 }
 0x132   :  { %2699 = vmatprep.subr.bf16.mxu1 %v6128_v51  ;;  %v6195_v51 = vld [vmem:[#allocation5 + $0x860] ss:$28 sps:$4 sm:$0xff]  }
 0x134   :  { %2667 = vmatpush1.bf16.msra.mxu0 %v6129_v55 }
 0x135   :  { %2700 = vmatpush1.bf16.msra.mxu1 %v6126_v54  ;;  %2668 = vmatprep.subr.bf16.mxu0 %v6137_v57  ;;  %v6200_v54 = vld [vmem:[#allocation5 + $0x58c] ss:$28 sps:$4 sm:$0xff]  }
 0x136   :  { %2701 = vmatprep.subr.bf16.mxu1 %v6134_v56  ;;  %v6203_v57 = vld [vmem:[#allocation5 + $0x82c] ss:$28 sps:$4 sm:$0xff]  }
 0x138   :  { %2669 = vmatpush1.bf16.msra.mxu0 %v6135_v59 }
 0x139   :  { %2702 = vmatpush1.bf16.msra.mxu1 %v6132_v58  ;;  %2670 = vmatprep.subr.bf16.mxu0 %v6143_v61 }
 0x13a   :  { %2703 = vmatprep.subr.bf16.mxu1 %v6140_v60 }
 0x13c   :  { %2671 = vmatpush2.bf16.msra.mxu0 %v6141_v63  ;;  %v6201_v63 = vld [vmem:[#allocation5 + $0x828] ss:$28 sps:$4 sm:$0xff]  }
 0x13d   :  { %2704 = vmatpush1.bf16.msra.mxu1 %v6138_v62  ;;  %2672 = vmatprep.subr.bf16.mxu0 %v6149_v1  ;;  %v6198_v62 = vld [vmem:[#allocation5 + $0x588] ss:$28 sps:$4 sm:$0xff]   ;;  %v6206_v1 = vld [vmem:[#allocation5 + $0x554] ss:$28 sps:$4 sm:$0xff]  }
 0x13e   :  { %2705 = vmatprep.subr.bf16.mxu1 %v6146_v0 }
 0x140   :  { %2673 = vmatpush2.bf16.msra.mxu0 %v6147_v3 }
 0x141   :  { %2706 = vmatpush1.bf16.msra.mxu1 %v6144_v2  ;;  %2674 = vmatprep.subr.bf16.mxu0 %v6155_v5 }
 0x142   :  { %2707 = vmatprep.subr.bf16.mxu1 %v6152_v4  ;;  %v6209_v4 = vld [vmem:[#allocation5 + $0x7f4] ss:$28 sps:$4 sm:$0xff]  }
 0x144   :  { %2675 = vmatpush2.bf16.msra.mxu0 %v6153_v7  ;;  %v6207_v7 = vld [vmem:[#allocation5 + $0x7f0] ss:$28 sps:$4 sm:$0xff]  }
 0x145   :  { %2708 = vmatpush1.bf16.msra.mxu1 %v6150_v6  ;;  %2676 = vmatprep.subr.bf16.mxu0 %v6161_v11  ;;  %v6204_v6 = vld [vmem:[#allocation5 + $0x550] ss:$28 sps:$4 sm:$0xff]  }
 0x146   :  { %2709 = vmatprep.subr.bf16.mxu1 %v6158_v10  ;;  %v6212_v10 = vld [vmem:[#allocation5 + $0x7bc] ss:$28 sps:$4 sm:$0xff]  }
 0x148   :  { %2677 = vmatpush2.bf16.msra.mxu0 %v6159_v13 }
 0x149   :  { %2710 = vmatpush1.bf16.msra.mxu1 %v6156_v12  ;;  %2678 = vmatprep.subr.bf16.mxu0 %v6167_v15  ;;  %v6215_v12 = vld [vmem:[#allocation5 + $0xa94] ss:$28 sps:$4 sm:$0xff]  }
 0x14a   :  { %2711 = vmatprep.subr.bf16.mxu1 %v6164_v14  ;;  %v6210_v14 = vld [vmem:[#allocation5 + $0x7b8] ss:$28 sps:$4 sm:$0xff]   ;;  %v6213_v15 = vld [vmem:[#allocation5 + $0xa90] ss:$28 sps:$4 sm:$0xff]  }
 0x14c   :  { %2679 = vmatpush2.bf16.msra.mxu0 %v6165_v18  ;;  %v6218_v18 = vld [vmem:[#allocation5 + $0x784] ss:$28 sps:$4 sm:$0xff]  }
 0x14d   :  { %2712 = vmatpush2.bf16.msra.mxu1 %v6162_v17  ;;  %2680 = vmatprep.subr.bf16.mxu0 %v6173_v22  ;;  %v6216_v22 = vld [vmem:[#allocation5 + $0x780] ss:$28 sps:$4 sm:$0xff]  }
 0x14e   :  { %2713 = vmatprep.subr.bf16.mxu1 %v6170_v20  ;;  %v6219_v20 = vld [vmem:[#allocation5 + $0x360] ss:$28 sps:$4 sm:$0xff]  }
 0x150   :  { %2681 = vmatpush2.bf16.msra.mxu0 %v6171_v24  ;;  %v6220_v24 = vld [vmem:[#allocation5 + $0x1a0] ss:$28 sps:$4 sm:$0xff]  }
 0x151   :  { %2714 = vmatpush2.bf16.msra.mxu1 %v6168_v23  ;;  %2682 = vmatprep.subr.bf16.mxu0 %v6179_v27  ;;  %v6223_v23 = vld [vmem:[#allocation5 + $0x74c] ss:$28 sps:$4 sm:$0xff]  }
 0x152   :  { %2715 = vmatprep.subr.bf16.mxu1 %v6176_v26  ;;  %v6221_v26 = vld [vmem:[#allocation5 + $0x748] ss:$28 sps:$4 sm:$0xff]  }
 0x153   :  { %v6224_v27 = vld [vmem:[#allocation5 + $0x328] ss:$28 sps:$4 sm:$0xff]  }
 0x154   :  { %2683 = vmatpush2.bf16.msra.mxu0 %v6177_v29  ;;  %v6225_v29 = vld [vmem:[#allocation5 + $0x168] ss:$28 sps:$4 sm:$0xff]  }
 0x155   :  { %2716 = vmatpush2.bf16.msra.mxu1 %v6174_v28  ;;  %2684 = vmatprep.subr.bf16.mxu0 %v6185_v32  ;;  %v6228_v28 = vld [vmem:[#allocation5 + $0x714] ss:$28 sps:$4 sm:$0xff]  }
 0x156   :  { %2717 = vmatprep.subr.bf16.mxu1 %v6182_v31  ;;  %v6226_v31 = vld [vmem:[#allocation5 + $0x710] ss:$28 sps:$4 sm:$0xff]  }
 0x157   :  { %v6229_v32 = vld [vmem:[#allocation5 + $0x2f0] ss:$28 sps:$4 sm:$0xff]  }
 0x158   :  { %2685 = vmatpush2.bf16.msra.mxu0 %v6183_v34  ;;  %v6230_v34 = vld [vmem:[#allocation5 + $0x130] ss:$28 sps:$4 sm:$0xff]  }
 0x159   :  { %2718 = vmatpush2.bf16.msra.mxu1 %v6180_v33  ;;  %2736 = vmatprep.subr.bf16.mxu0 %v6191_v39  ;;  %v6233_v33 = vld [vmem:[#allocation5 + $0xa5c] ss:$28 sps:$4 sm:$0xff]   ;;  %v6238_v39 = vld [vmem:[#allocation5 + $0xa24] ss:$28 sps:$4 sm:$0xff]  }
 0x15a   :  { %2719 = vmatprep.subr.bf16.mxu1 %v6188_v35  ;;  %v6231_v35 = vld [vmem:[#allocation5 + $0xa58] ss:$28 sps:$4 sm:$0xff]  }
 0x15b   :  { %v2360_v47 = vpop.f32.mrf.mxu0  ;;  %2687 = vmatmul.mubr.bf16.vlgmr.msra.gmra.mxu0 %v6925_v8 }
 0x15c   :  { %v2401_v48 = vpop.f32.mrf.mxu1  ;;  %v2361_v53 = vadd.f32 %v2360_v47, %v526_v43  ;;  %2737 = vmatpush1.bf16.msra.mxu0 %v6189_v42  ;;  %2768 = vmatprep.mubr.bf16.mxu0 %v6937_v36  ;;  %v6236_v42 = vld [vmem:[#allocation5 + $0xa20] ss:$28 sps:$4 sm:$0xff]   ;;  %v6244_v47 = vld [vmem:[#allocation5 + $0x248] ss:$28 sps:$4 sm:$0xff]  }
 0x15d   :  { %2720 = vmatpush2.bf16.msra.mxu1 %v6186_v41  ;;  %v2362_v55 = vpop.f32.mrf.mxu0  ;;  %2738 = vmatprep.subr.bf16.mxu0 %v6197_v45  ;;  %v6235_v41 = vld [vmem:[#allocation5 + $0xf8] ss:$28 sps:$4 sm:$0xff]   ;;  %v6239_v43 = vld [vmem:[#allocation5 + $0x280] ss:$28 sps:$4 sm:$0xff]  }
 0x15e   :  { %2721 = vmatprep.subr.bf16.mxu1 %v6194_v44  ;;  %v2403_v56 = vpop.f32.mrf.mxu1  ;;  %v2363_v58 = vadd.f32 %v2362_v55, %v530_v46  ;;  %v6963_v59 = vadd.f32 %v2401_v48, %v2361_v53  ;;  %v6243_v44 = vld [vmem:[#allocation5 + $0x9ec] ss:$28 sps:$4 sm:$0xff]   ;;  %v6240_v45 = vld [vmem:[#allocation5 + $0xc0] ss:$28 sps:$4 sm:$0xff]   ;;  %v6251_v55 = vld [vmem:[#allocation5 + $0x978] ss:$28 sps:$4 sm:$0xff]  }
 0x15f   :  { %v2364_v60 = vpop.f32.mrf.mxu0  ;;  %v6241_v46 = vld [vmem:[#allocation5 + $0x9e8] ss:$28 sps:$4 sm:$0xff]   ;;  %v6253_v53 = vld [vmem:[#allocation5 + $0x97c] ss:$28 sps:$4 sm:$0xff]  }
 0x160   :  { %v2405_v61 = vpop.f32.mrf.mxu1  ;;  %v6966_v0 = vadd.f32 %v2403_v56, %v2363_v58  ;;  %2739 = vmatpush1.bf16.msra.mxu0 %v6195_v51  ;;  %v6245_v48 = vld [vmem:[#allocation5 + $0x88] ss:$28 sps:$4 sm:$0xff]   ;;  %v6249_v51 = vld [vmem:[#allocation5 + $0x210] ss:$28 sps:$4 sm:$0xff]   ;;  %v6254_v56 = vld [vmem:[#allocation5 + $0x1d8] ss:$28 sps:$4 sm:$0xff]  }
 0x161   :  { %2722 = vmatpush2.bf16.msra.mxu1 %v6192_v50  ;;  %v2365_v2 = vpop.f32.mrf.mxu0  ;;  %2740 = vmatprep.subr.bf16.mxu0 %v6203_v57  ;;  %v6246_v50 = vld [vmem:[#allocation5 + $0x9b0] ss:$28 sps:$4 sm:$0xff]   ;;  %v6258_v57 = vld [vmem:[#allocation5 + $0x944] ss:$28 sps:$4 sm:$0xff]   ;;  %v6255_v58 = vld [vmem:[#allocation5 + $0x18] ss:$28 sps:$4 sm:$0xff]  }
 0x162   :  { %2723 = vmatprep.subr.bf16.mxu1 %v6200_v54  ;;  %v2406_v3 = vpop.f32.mrf.mxu1  ;;  %v6250_v54 = vld [vmem:[#allocation5 + $0x50] ss:$28 sps:$4 sm:$0xff]   ;;  %v6256_v60 = vld [vmem:[#allocation5 + $0x940] ss:$28 sps:$4 sm:$0xff]   ;;  %v6264_v2 = vld [vmem:[#allocation5 + $0x6a8] ss:$28 sps:$4 sm:$0xff]  }
 0x163   :  { %v6259_v61 = vld [vmem:[#allocation5 + $0x6e0] ss:$28 sps:$4 sm:$0xff]   ;;  %v6268_v3 = vld [vmem:[#allocation5 + $0x8d4] ss:$28 sps:$4 sm:$0xff]  }
 0x164   :  { %v6968_v5 = vpop.f32.mrf.mxu1  ;;  %2741 = vmatpush1.bf16.msra.mxu0 %v6201_v63  ;;  %v6260_v63 = vld [vmem:[#allocation5 + $0x520] ss:$28 sps:$4 sm:$0xff]  }
 0x165   :  { %2724 = vmatpush2.bf16.msra.mxu1 %v6198_v62  ;;  %2742 = vmatprep.subr.bf16.mxu0 %v6209_v4  ;;  %v6263_v62 = vld [vmem:[#allocation5 + $0x90c] ss:$28 sps:$4 sm:$0xff]  }
 0x166   :  { %2725 = vmatprep.subr.bf16.mxu1 %v6206_v1  ;;  %v6970_v11 = vpop.f32.mrf.mxu1  ;;  %v6261_v1 = vld [vmem:[#allocation5 + $0x908] ss:$28 sps:$4 sm:$0xff]  }
 0x167   :  { %v6265_v4 = vld [vmem:[#allocation5 + $0x4e8] ss:$28 sps:$4 sm:$0xff]  }
 0x168   :  { %v2487_v13 = vpop.f32.mrf.mxu1  ;;  %2743 = vmatpush1.bf16.msra.mxu0 %v6207_v7  ;;  %v6269_v7 = vld [vmem:[#allocation5 + $0x670] ss:$28 sps:$4 sm:$0xff]  }
 0x169   :  { %2726 = vmatpush2.bf16.msra.mxu1 %v6204_v6  ;;  %2744 = vmatprep.subr.bf16.mxu0 %v6212_v10  ;;  %v6266_v6 = vld [vmem:[#allocation5 + $0x8d0] ss:$28 sps:$4 sm:$0xff]   ;;  %v6271_v10 = vld [vmem:[#allocation5 + $0xa60] ss:$28 sps:$4 sm:$0xff]  }
 0x16a   :  { %v2488_v17 = vpop.f32.mrf.mxu1  ;;  %2791 = vmatprep.subr.bf16.mxu1 %v6215_v12  ;;  %v6270_v12 = vld [vmem:[#allocation5 + $0x4b0] ss:$28 sps:$4 sm:$0xff]   ;;  %v6273_v13 = vld [vmem:[#allocation5 + $0x8a0] ss:$28 sps:$4 sm:$0xff]  }
 0x16b   :  { %v6274_v17 = vld [vmem:[#allocation5 + $0x478] ss:$28 sps:$4 sm:$0xff]  }
 0x16c   :  { %2728 = vmatmul.mubr.bf16.vlgmr.msra.gmra.mxu1 %v6927_v9  ;;  %2745 = vmatpush1.bf16.msra.mxu0 %v6210_v14  ;;  %v6272_v14 = vld [vmem:[#allocation5 + $0x638] ss:$28 sps:$4 sm:$0xff]  }
 0x16d   :  { %2792 = vmatpush1.bf16.msra.mxu1 %v6213_v15  ;;  %2746 = vmatprep.subr.bf16.mxu0 %v6218_v18  ;;  %v6275_v15 = vld [vmem:[#allocation5 + $0xa28] ss:$28 sps:$4 sm:$0xff]  }
 0x16e   :  { %2809 = vmatprep.mubr.bf16.mxu1 %v6854_v16  ;;  %5673 = vmatprep.subr.bf16.mxu1 %v6219_v20  ;;  %v6277_v18 = vld [vmem:[#allocation5 + $0x868] ss:$28 sps:$4 sm:$0xff]  }
 0x170   :  { %2747 = vmatpush1.bf16.msra.mxu0 %v6216_v22  ;;  %v6279_v22 = vld [vmem:[#allocation5 + $0x9f0] ss:$28 sps:$4 sm:$0xff]  }
 0x171   :  { %2748 = vmatprep.subr.bf16.mxu0 %v6223_v23 }
 0x174   :  { %5414 = vmatmul.mubr.msk.bf16.vlgmr.msra.gmra.mxu1 %vm2322_vm0, %v6932_v19  ;;  %2749 = vmatpush1.bf16.msra.mxu0 %v6221_v26 }
 0x175   :  { %5674 = vmatpush3.bf16.msra.mxu1 %v6220_v24  ;;  %2750 = vmatprep.subr.bf16.mxu0 %v6228_v28  ;;  %v6281_v28 = vld [vmem:[#allocation5 + $0x830] ss:$28 sps:$4 sm:$0xff]  }
 0x176   :  { %5675 = vmatprep.subr.bf16.mxu1 %v6224_v27  ;;  %2850 = vmatprep.mubr.bf16.mxu1 %v6919_v49  ;;  %v6248_v49 = vld [vmem:[#allocation5 + $0x9b4] ss:$28 sps:$4 sm:$0xff]   ;;  %v6278_v27 = vld [vmem:[#allocation5 + $0x440] ss:$28 sps:$4 sm:$0xff]  }
 0x178   :  { %2751 = vmatpush1.bf16.msra.mxu0 %v6226_v31 }
 0x179   :  { %5676 = vmatpush3.bf16.msra.mxu1 %v6225_v29  ;;  %2752 = vmatprep.subr.bf16.mxu0 %v6233_v33  ;;  %v6283_v33 = vld [vmem:[#allocation5 + $0x9b8] ss:$28 sps:$4 sm:$0xff]  }
 0x17a   :  { %5677 = vmatprep.subr.bf16.mxu1 %v6229_v32  ;;  %v6280_v32 = vld [vmem:[#allocation5 + $0x5c8] ss:$28 sps:$4 sm:$0xff]  }
 0x17c   :  { %2753 = vmatpush2.bf16.msra.mxu0 %v6231_v35  ;;  %v6285_v35 = vld [vmem:[#allocation5 + $0x7f8] ss:$28 sps:$4 sm:$0xff]  }
 0x17d   :  { %5678 = vmatpush3.bf16.msra.mxu1 %v6230_v34  ;;  %2754 = vmatprep.subr.bf16.mxu0 %v6238_v39  ;;  %v6282_v34 = vld [vmem:[#allocation5 + $0x408] ss:$28 sps:$4 sm:$0xff]   ;;  %v6289_v39 = vld [vmem:[#allocation5 + $0x7c0] ss:$28 sps:$4 sm:$0xff]  }
 0x17e   :  { %5679 = vmatprep.subr.bf16.mxu1 %v6234_v37  ;;  %v6284_v37 = vld [vmem:[#allocation5 + $0x590] ss:$28 sps:$4 sm:$0xff]  }
 0x180   :  { %2755 = vmatpush2.bf16.msra.mxu0 %v6236_v42  ;;  %v6288_v42 = vld [vmem:[#allocation5 + $0x558] ss:$28 sps:$4 sm:$0xff]  }
 0x181   :  { %5680 = vmatpush3.bf16.msra.mxu1 %v6235_v41  ;;  %2756 = vmatprep.subr.bf16.mxu0 %v6243_v44 }
 0x182   :  { %5681 = vmatprep.subr.bf16.mxu1 %v6239_v43  ;;  %v6291_v43 = vld [vmem:[#allocation5 + $0x948] ss:$28 sps:$4 sm:$0xff]  }
 0x184   :  { %2757 = vmatpush2.bf16.msra.mxu0 %v6241_v46  ;;  %v6292_v46 = vld [vmem:[#allocation5 + $0x788] ss:$28 sps:$4 sm:$0xff]  }
 0x185   :  { %5682 = vmatpush3.bf16.msra.mxu1 %v6240_v45  ;;  %2758 = vmatprep.subr.bf16.mxu0 %v6248_v49  ;;  %v6290_v45 = vld [vmem:[#allocation5 + $0x398] ss:$28 sps:$4 sm:$0xff]   ;;  %v6294_v49 = vld [vmem:[#allocation5 + $0x750] ss:$28 sps:$4 sm:$0xff]  }
 0x186   :  { %5683 = vmatprep.subr.bf16.mxu1 %v6244_v47  ;;  %v6293_v47 = vld [vmem:[#allocation5 + $0x910] ss:$28 sps:$4 sm:$0xff]  }
 0x188   :  { %2759 = vmatpush2.bf16.msra.mxu0 %v6246_v50  ;;  %v6855_v50 = vmov 0.0  }
 0x189   :  { %5684 = vmatpush3.bf16.msra.mxu1 %v6245_v48  ;;  %2760 = vmatprep.subr.bf16.mxu0 %v6253_v53  ;;  %v6295_v48 = vld [vmem:[#allocation5 + $0xa98] ss:$28 sps:$4 sm:$0xff]  }
 0x18a   :  { %5685 = vmatprep.subr.bf16.mxu1 %v6249_v51  ;;  %v6296_v51 = vld [vmem:[#allocation5 + $0x8d8] ss:$28 sps:$4 sm:$0xff]  }
 0x18b   :  { %v6299_v53 = vld [vmem:[#allocation8 + $0xe4] ss:$16 sps:$4 sm:$0xff]  }
 0x18c   :  { %2761 = vmatpush2.bf16.msra.mxu0 %v6251_v55 }
 0x18d   :  { %5686 = vmatpush3.bf16.msra.mxu1 %v6250_v54  ;;  %2762 = vmatprep.subr.bf16.mxu0 %v6258_v57  ;;  %v6300_v54 = vld [vmem:[#allocation5 + $0x718] ss:$28 sps:$4 sm:$0xff]   ;;  %v6297_v57 = vld [vmem:[#allocation8 + $0xe0] ss:$16 sps:$4 sm:$0xff]  }
 0x18e   :  { %5687 = vmatprep.subr.bf16.mxu1 %v6254_v56  ;;  %v6306_v56 = vld [vmem:[#allocation8 + $0x2e4] ss:$16 sps:$4 sm:$0xff]  }
 0x190   :  { %2763 = vmatpush2.bf16.msra.mxu0 %v6256_v60  ;;  %v6304_v60 = vld [vmem:[#allocation8 + $0x2e0] ss:$16 sps:$4 sm:$0xff]  }
 0x191   :  { %5688 = vmatpush3.bf16.msra.mxu1 %v6255_v58  ;;  %2764 = vmatprep.subr.bf16.mxu0 %v6263_v62  ;;  %v6303_v58 = vld [vmem:[#allocation8 + $0xc4] ss:$16 sps:$4 sm:$0xff]  }
 0x192   :  { %5695 = vmatprep.subr.bf16.mxu1 %v6259_v61  ;;  %v6312_v62 = vld [vmem:[#allocation8 + $0x2c4] ss:$16 sps:$4 sm:$0xff]  }
 0x194   :  { %2851 = vmatmul.mubr.bf16.vlgmr.msra.gmra.mxu1 %v6925_v8  ;;  %2765 = vmatpush2.bf16.msra.mxu0 %v6261_v1  ;;  %v6276_v8 = vld [vmem:[#allocation5 + $0x600] ss:$28 sps:$4 sm:$0xff]  }
 0x195   :  { %5696 = vmatpush3.bf16.msra.mxu1 %v6260_v63  ;;  %2766 = vmatprep.subr.bf16.mxu0 %v6268_v3  ;;  %v6309_v63 = vld [vmem:[#allocation8 + $0xa4] ss:$16 sps:$4 sm:$0xff]   ;;  %v6310_v1 = vld [vmem:[#allocation8 + $0x2c0] ss:$16 sps:$4 sm:$0xff]  }
 0x196   :  { %5697 = vmatprep.subr.bf16.mxu1 %v6264_v2  ;;  %2890 = vmatprep.mubr.bf16.mxu1 %v6921_v52  ;;  %v6318_v2 = vld [vmem:[#allocation8 + $0x2a4] ss:$16 sps:$4 sm:$0xff]   ;;  %v6307_v3 = vld [vmem:[#allocation8 + $0xa0] ss:$16 sps:$4 sm:$0xff]  }
 0x198   :  { %2767 = vmatpush2.bf16.msra.mxu0 %v6266_v6  ;;  %v6316_v6 = vld [vmem:[#allocation8 + $0x2a0] ss:$16 sps:$4 sm:$0xff]  }
 0x199   :  { %5698 = vmatpush3.bf16.msra.mxu1 %v6265_v4  ;;  %5717 = vmatprep.subr.bf16.mxu0 %v6271_v10  ;;  %v6315_v4 = vld [vmem:[#allocation8 + $0x84] ss:$16 sps:$4 sm:$0xff]   ;;  %v6322_v10 = vld [vmem:[#allocation8 + $0x280] ss:$16 sps:$4 sm:$0xff]  }
 0x19a   :  { %5699 = vmatprep.subr.bf16.mxu1 %v6269_v7  ;;  %v6324_v7 = vld [vmem:[#allocation8 + $0x284] ss:$16 sps:$4 sm:$0xff]  }
 0x19b   :  { %v2442_v20 = vpop.f32.mrf.mxu0  ;;  %2769 = vmatmul.mubr.bf16.vlgmr.msra.gmra.mxu0 %v6940_v21 }
 0x19c   :  { %v2443_v23 = vadd.f32 %v2442_v20, %v6963_v59  ;;  %5718 = vmatpush3.bf16.msra.mxu0 %v6273_v13  ;;  %2930 = vmatprep.mubr.bf16.mxu0 %v6937_v36  ;;  %v6319_v13 = vld [vmem:[#allocation8 + $0x60] ss:$16 sps:$4 sm:$0xff]   ;;  %v6333_v20 = vld [vmem:[#allocation8 + $0x24] ss:$16 sps:$4 sm:$0xff]  }
 0x19d   :  { %5700 = vmatpush3.bf16.msra.mxu1 %v6270_v12  ;;  %v2444_v24 = vpop.f32.mrf.mxu0  ;;  %5719 = vmatprep.subr.bf16.mxu0 %v6275_v15  ;;  %v6330_v12 = vld [vmem:[#allocation8 + $0x264] ss:$16 sps:$4 sm:$0xff]   ;;  %v6328_v15 = vld [vmem:[#allocation8 + $0x260] ss:$16 sps:$4 sm:$0xff]  }
 0x19e   :  { %5701 = vmatprep.subr.bf16.mxu1 %v6272_v14  ;;  %v6982_v52 = vadd.f32 %v6968_v5, %v2443_v23  ;;  %v2445_v26 = vadd.f32 %v2444_v24, %v6966_v0  ;;  %v6287_v0 = vld [vmem:[#allocation5 + $0x980] ss:$28 sps:$4 sm:$0xff]   ;;  %v6327_v14 = vld [vmem:[#allocation8 + $0x44] ss:$16 sps:$4 sm:$0xff]  }
 0x19f   :  { %v2446_v29 = vpop.f32.mrf.mxu0  ;;  %v6331_v23 = vld [vmem:[#allocation8 + $0x20] ss:$16 sps:$4 sm:$0xff]   ;;  %v6339_v24 = vld [vmem:[#allocation8 + $0x4] ss:$16 sps:$4 sm:$0xff]  }
 0x1a0   :  { %v2486_v31 = vadd.f32 %v6970_v11, %v2445_v26  ;;  %5720 = vmatpush3.bf16.msra.mxu0 %v6277_v18  ;;  %v6286_v11 = vld [vmem:[#allocation5 + $0x3d0] ss:$28 sps:$4 sm:$0xff]   ;;  %v6345_v29 = vld [vmem:[#allocation8 + $0x1e4] ss:$16 sps:$4 sm:$0xff]  }
 0x1a1   :  { %5702 = vmatpush3.bf16.msra.mxu1 %v6274_v17  ;;  %v2447_v59 = vpop.f32.mrf.mxu0  ;;  %5721 = vmatprep.subr.bf16.mxu0 %v6279_v22  ;;  %v6336_v17 = vld [vmem:[#allocation8 + $0x244] ss:$16 sps:$4 sm:$0xff]   ;;  %v6325_v18 = vld [vmem:[#allocation8 + $0x40] ss:$16 sps:$4 sm:$0xff]  }
 0x1a2   :  { %5703 = vmatprep.subr.bf16.mxu1 %v6276_v8  ;;  %v2979_v55 = vmax.f32 %v2486_v31, 0.0  ;;  %v6334_v8 = vld [vmem:[#allocation8 + $0x240] ss:$16 sps:$4 sm:$0xff]   ;;  %v6342_v22 = vld [vmem:[#allocation8 + $0x224] ss:$16 sps:$4 sm:$0xff]  }
 0x1a3   :  { %v6340_v26 = vld [vmem:[#allocation8 + $0x220] ss:$16 sps:$4 sm:$0xff]   ;;  %v6354_v59 = vld [vmem:[#allocation8 + $0x3e4] ss:$16 sps:$4 sm:$0xff]  }
 0x1a4   :  { %v6987_v5 = vpop.f32.mrf.mxu1  ;;  %5722 = vmatpush3.bf16.msra.mxu0 %v6281_v28  ;;  %v6992_v61 = vpack.c.bf16 %v2979_v55, %v2979_v55  ;;  %v6337_v28 = vld [vmem:[#allocation8] ss:$16 sps:$4 sm:$0xff]  }
 0x1a5   :  { %5704 = vmatpush3.bf16.msra.mxu1 %v6278_v27  ;;  %5723 = vmatprep.subr.bf16.mxu0 %v6283_v33  ;;  %v6348_v27 = vld [vmem:[#allocation8 + $0x204] ss:$16 sps:$4 sm:$0xff]   ;;  %v6346_v31 = vld [vmem:[#allocation8 + $0x200] ss:$16 sps:$4 sm:$0xff]  }
 0x1a6   :  { %5705 = vmatprep.subr.bf16.mxu1 %v6280_v32  ;;  %v6989_v36 = vpop.f32.mrf.mxu1  ;;  %v6343_v32 = vld [vmem:[#allocation8 + $0x1e0] ss:$16 sps:$4 sm:$0xff]   ;;  %v6351_v33 = vld [vmem:[#allocation8 + $0x1c4] ss:$16 sps:$4 sm:$0xff]  }
 0x1a7   :  { %v6361_v55 = vld [vmem:[#allocation8 + $0x180] ss:$16 sps:$4 sm:$0xff]  }
 0x1a8   :  { %v2528_v41 = vpop.f32.mrf.mxu1  ;;  %5724 = vmatpush3.bf16.msra.mxu0 %v6285_v35  ;;  %v6360_v35 = vld [vmem:[#allocation8 + $0x3c4] ss:$16 sps:$4 sm:$0xff]  }
 0x1a9   :  { %5706 = vmatpush3.bf16.msra.mxu1 %v6282_v34  ;;  %5725 = vmatprep.subr.bf16.mxu0 %v6287_v0  ;;  %v6352_v34 = vld [vmem:[#allocation8 + $0x3e0] ss:$16 sps:$4 sm:$0xff]  }
 0x1aa   :  { %5707 = vmatprep.subr.bf16.mxu1 %v6284_v37  ;;  %v2529_v44 = vpop.f32.mrf.mxu1  ;;  %v6349_v0 = vld [vmem:[#allocation8 + $0x1c0] ss:$16 sps:$4 sm:$0xff]  }
 0x1ab   :  { %v6358_v41 = vld [vmem:[#allocation8 + $0x3c0] ss:$16 sps:$4 sm:$0xff]   ;;  %v537_v44 = vsub.s32 3, %v6954_v30 }
 0x1ac   :  { %5726 = vmatpush3.bf16.msra.mxu0 %v6289_v39  ;;  %v6357_v39 = vld [vmem:[#allocation8 + $0x1a4] ss:$16 sps:$4 sm:$0xff]  }
 0x1ad   :  { %5708 = vmatpush3.bf16.msra.mxu1 %v6286_v11  ;;  %5727 = vmatprep.subr.bf16.mxu0 %v6291_v43 }
 0x1ae   :  { %5709 = vmatprep.subr.bf16.mxu1 %v6288_v42  ;;  %v6366_v42 = vld [vmem:[#allocation8 + $0x3a4] ss:$16 sps:$4 sm:$0xff]  }
 0x1b0   :  { %5728 = vmatpush3.bf16.msra.mxu0 %v6292_v46 }
 0x1b1   :  { %5710 = vmatpush3.bf16.msra.mxu1 %v6290_v45  ;;  %5729 = vmatprep.subr.bf16.mxu0 %v6293_v47  ;;  %v6355_v45 = vld [vmem:[#allocation8 + $0x1a0] ss:$16 sps:$4 sm:$0xff]   ;;  %v6363_v47 = vld [vmem:[#allocation8 + $0x184] ss:$16 sps:$4 sm:$0xff]  }
 0x1b2   :  { %5785 = vmatprep.subr.bf16.mxu1 %v6855_v50 }
 0x1b4   :  { %2891 = vmatmul.mubr.bf16.vlgmr.msra.gmra.mxu1 %v6927_v9  ;;  %5730 = vmatpush3.bf16.msra.mxu0 %v6294_v49  ;;  %v6301_v9 = vld [vmem:[#allocation8 + $0xc0] ss:$16 sps:$4 sm:$0xff]  }
 0x1b5   :  { %5786 = vmatpush3.bf16.msra.mxu1 %v6295_v48  ;;  %5731 = vmatprep.subr.bf16.mxu0 %v6296_v51  ;;  %v6364_v49 = vld [vmem:[#allocation8 + $0x3a0] ss:$16 sps:$4 sm:$0xff]   ;;  %v6372_v48 = vld [vmem:[#allocation8 + $0x384] ss:$16 sps:$4 sm:$0xff]   ;;  %v533_v51 = vsub.s32 2, %v6954_v30 }
 0x1b6   :  { %5787 = vmatprep.mubr.msk.bf16.mxu1 %vm6856_vm1, %v6855_v50  ;;  %4358 = vmatprep.subr.bf16.mxu1 %v6299_v53  ;;  %v7000_v53 = vld [vmem:[#allocation7] sm:$0xff] }
 0x1b8   :  { %5732 = vmatpush3.bf16.msra.mxu0 %v6300_v54  ;;  %v538_v54 = vrot.slane %v7000_v53, %v537_v44 }
 0x1b9   :  { %4399 = vmatprep.subr.bf16.mxu0 %v6306_v56 }
 0x1bb   :  { %2931 = vmatmul.mubr.bf16.vlgmr.msra.gmra.mxu0 %v6940_v21  ;;  %v6321_v21 = vld [vmem:[#allocation8 + $0x64] ss:$16 sps:$4 sm:$0xff]  }
 0x1bc   :  { %5788 = vmatmul.mubr.msk.bf16.vlgmr.msra.gmra.mxu1 %vm2322_vm0, %v6932_v19  ;;  %4400 = vmatpush1.bf16.msra.mxu0 %v6304_v60  ;;  %v6313_v19 = vld [vmem:[#allocation8 + $0x80] ss:$16 sps:$4 sm:$0xff]   ;;  %v6378_v60 = vld [vmem:[#allocation8 + $0x364] ss:$16 sps:$4 sm:$0xff]  }
 0x1bd   :  { %4359 = vmatpush1.bf16.msra.mxu1 %v6297_v57  ;;  %4390 = vmatprep.mubr.bf16.mxu1 %v6992_v61  ;;  %v6369_v57 = vld [vmem:[#allocation8 + $0x164] ss:$16 sps:$4 sm:$0xff]  }
 0x1be   :  { %4360 = vmatprep.subr.bf16.mxu1 %v6303_v58  ;;  %4401 = vmatprep.subr.bf16.mxu0 %v6312_v62  ;;  %v6370_v58 = vld [vmem:[#allocation8 + $0x380] ss:$16 sps:$4 sm:$0xff]  }
 0x1c0   :  { %4402 = vmatpush1.bf16.msra.mxu0 %v6310_v1  ;;  %v6367_v1 = vld [vmem:[#allocation8 + $0x160] ss:$16 sps:$4 sm:$0xff]  }
 0x1c1   :  { %4361 = vmatpush1.bf16.msra.mxu1 %v6301_v9  ;;  %4403 = vmatprep.subr.bf16.mxu0 %v6318_v2  ;;  %v534_v9 = vrot.slane %v7000_v53, %v533_v51 }
 0x1c2   :  { %4362 = vmatprep.subr.bf16.mxu1 %v6309_v63  ;;  %v2527_v63 = vadd.f32 %v6989_v36, %v538_v54  ;;  %v6381_v36 = vld [vmem:[#allocation8 + $0x124] ss:$16 sps:$4 sm:$0xff]   ;;  %v6403_v54 = vld [vmem:[#allocation8 + $0x480] ss:$16 sps:$4 sm:$0xff]  }
 0x1c4   :  { %4404 = vmatpush1.bf16.msra.mxu0 %v6316_v6 }
 0x1c5   :  { %4363 = vmatpush1.bf16.msra.mxu1 %v6307_v3  ;;  %4405 = vmatprep.subr.bf16.mxu0 %v6324_v7  ;;  %v6375_v3 = vld [vmem:[#allocation8 + $0x144] ss:$16 sps:$4 sm:$0xff]  }
 0x1c6   :  { %4364 = vmatprep.subr.bf16.mxu1 %v6315_v4  ;;  %v6376_v4 = vld [vmem:[#allocation8 + $0x360] ss:$16 sps:$4 sm:$0xff]   ;;  %v6384_v7 = vld [vmem:[#allocation8 + $0x344] ss:$16 sps:$4 sm:$0xff]  }
 0x1c8   :  { %4406 = vmatpush1.bf16.msra.mxu0 %v6322_v10 }
 0x1c9   :  { %4365 = vmatpush1.bf16.msra.mxu1 %v6313_v19  ;;  %4407 = vmatprep.subr.bf16.mxu0 %v6330_v12  ;;  %v6373_v12 = vld [vmem:[#allocation8 + $0x140] ss:$16 sps:$4 sm:$0xff]  }
 0x1ca   :  { %4366 = vmatprep.subr.bf16.mxu1 %v6321_v21  ;;  %v2525_v21 = vadd.f32 %v6987_v5, %v534_v9  ;;  %v6477_v9 = vld [vmem:[#allocation8 + $0x644] ss:$16 sps:$4 sm:$0xff]  }
 0x1cc   :  { %4408 = vmatpush1.bf16.msra.mxu0 %v6328_v15 }
 0x1cd   :  { %4367 = vmatpush1.bf16.msra.mxu1 %v6319_v13  ;;  %4409 = vmatprep.subr.bf16.mxu0 %v6336_v17 }
 0x1ce   :  { %4368 = vmatprep.subr.bf16.mxu1 %v6327_v14  ;;  %v6382_v14 = vld [vmem:[#allocation8 + $0x340] ss:$16 sps:$4 sm:$0xff]  }
 0x1d0   :  { %4410 = vmatpush1.bf16.msra.mxu0 %v6334_v8 }
 0x1d1   :  { %4369 = vmatpush1.bf16.msra.mxu1 %v6325_v18  ;;  %4411 = vmatprep.subr.bf16.mxu0 %v6342_v22  ;;  %v6390_v18 = vld [vmem:[#allocation8 + $0x324] ss:$16 sps:$4 sm:$0xff]  }
 0x1d2   :  { %4370 = vmatprep.subr.bf16.mxu1 %v6333_v20 }
 0x1d4   :  { %4412 = vmatpush1.bf16.msra.mxu0 %v6340_v26  ;;  %v6388_v26 = vld [vmem:[#allocation8 + $0x320] ss:$16 sps:$4 sm:$0xff]  }
 0x1d5   :  { %4371 = vmatpush1.bf16.msra.mxu1 %v6331_v23  ;;  %4413 = vmatprep.subr.bf16.mxu0 %v6348_v27  ;;  %v6379_v23 = vld [vmem:[#allocation8 + $0x120] ss:$16 sps:$4 sm:$0xff]  }
 0x1d6   :  { %4372 = vmatprep.subr.bf16.mxu1 %v6339_v24  ;;  %v6387_v24 = vld [vmem:[#allocation8 + $0x104] ss:$16 sps:$4 sm:$0xff]  }
 0x1d8   :  { %4414 = vmatpush1.bf16.msra.mxu0 %v6346_v31  ;;  %v6385_v31 = vld [vmem:[#allocation8 + $0x100] ss:$16 sps:$4 sm:$0xff]  }
 0x1d9   :  { %4373 = vmatpush1.bf16.msra.mxu1 %v6337_v28  ;;  %4415 = vmatprep.subr.bf16.mxu0 %v6354_v59  ;;  %v2978_v59 = vmax.f32 %v6982_v52, 0.0  ;;  %v6397_v52 = vld [vmem:[#allocation8 + $0x4c0] ss:$16 sps:$4 sm:$0xff]  }
 0x1da   :  { %4374 = vmatprep.subr.bf16.mxu1 %v6345_v29  ;;  %v6393_v29 = vld [vmem:[#allocation8 + $0x304] ss:$16 sps:$4 sm:$0xff]  }
 0x1db   :  { %v2565_v37 = vpop.f32.mrf.mxu0 }
 0x1dc   :  { %4416 = vmatpush2.bf16.msra.mxu0 %v6352_v34  ;;  %v2566_v15 = vadd.f32 %v2565_v37, %v2525_v21  ;;  %v6394_v37 = vld [vmem:[#allocation8 + $0x4e0] ss:$16 sps:$4 sm:$0xff]  }
 0x1dd   :  { %4375 = vmatpush2.bf16.msra.mxu1 %v6343_v32  ;;  %v2567_v11 = vpop.f32.mrf.mxu0  ;;  %4417 = vmatprep.subr.bf16.mxu0 %v6360_v35  ;;  %v6391_v32 = vld [vmem:[#allocation8 + $0x300] ss:$16 sps:$4 sm:$0xff]   ;;  %v6447_v35 = vld [vmem:[#allocation8 + $0x6e4] ss:$16 sps:$4 sm:$0xff]  }
 0x1de   :  { %4376 = vmatprep.subr.bf16.mxu1 %v6351_v33  ;;  %v2568_v6 = vadd.f32 %v2567_v11, %v2527_v63  ;;  %v6396_v33 = vld [vmem:[#allocation8 + $0x4e4] ss:$16 sps:$4 sm:$0xff]   ;;  %v6409_v63 = vld [vmem:[#allocation8 + $0x440] ss:$16 sps:$4 sm:$0xff]  }
 0x1df   :  { %v2569_v43 = vpop.f32.mrf.mxu0  ;;  %v6399_v11 = vld [vmem:[#allocation8 + $0x4c4] ss:$16 sps:$4 sm:$0xff]   ;;  %v6415_v21 = vld [vmem:[#allocation8 + $0x400] ss:$16 sps:$4 sm:$0xff]  }
 0x1e0   :  { %4418 = vmatpush2.bf16.msra.mxu0 %v6358_v41  ;;  %v6402_v43 = vld [vmem:[#allocation8 + $0x4a4] ss:$16 sps:$4 sm:$0xff]  }
 0x1e1   :  { %4377 = vmatpush2.bf16.msra.mxu1 %v6349_v0  ;;  %v2570_v46 = vpop.f32.mrf.mxu0  ;;  %4419 = vmatprep.subr.bf16.mxu0 %v6366_v42  ;;  %v7014_v0 = vpack.c.bf16 %v2978_v59, %v2978_v59  ;;  %v6453_v42 = vld [vmem:[#allocation8 + $0x6c4] ss:$16 sps:$4 sm:$0xff]   ;;  %v6433_v59 = vld [vmem:[#allocation8 + $0x540] ss:$16 sps:$4 sm:$0xff]  }
 0x1e2   :  { %4378 = vmatprep.subr.bf16.mxu1 %v6357_v39  ;;  %v6445_v39 = vld [vmem:[#allocation8 + $0x6e0] ss:$16 sps:$4 sm:$0xff]   ;;  %v6459_v46 = vld [vmem:[#allocation8 + $0x6a4] ss:$16 sps:$4 sm:$0xff]  }
 0x1e4   :  { %v2606_v50 = vpop.f32.mrf.mxu1  ;;  %4420 = vmatpush2.bf16.msra.mxu0 %v6364_v49  ;;  %v6405_v49 = vld [vmem:[#allocation8 + $0x484] ss:$16 sps:$4 sm:$0xff]  }
 0x1e5   :  { %4379 = vmatpush2.bf16.msra.mxu1 %v6355_v45  ;;  %4421 = vmatprep.subr.bf16.mxu0 %v6372_v48  ;;  %v2607_v8 = vadd.f32 %v2606_v50, %v2566_v15  ;;  %v6451_v45 = vld [vmem:[#allocation8 + $0x6c0] ss:$16 sps:$4 sm:$0xff]   ;;  %v6465_v50 = vld [vmem:[#allocation8 + $0x684] ss:$16 sps:$4 sm:$0xff]  }
 0x1e6   :  { %4380 = vmatprep.subr.bf16.mxu1 %v6363_v47  ;;  %v2608_v56 = vpop.f32.mrf.mxu1  ;;  %v6400_v47 = vld [vmem:[#allocation8 + $0x4a0] ss:$16 sps:$4 sm:$0xff]  }
 0x1e7   :  { %v2609_v10 = vadd.f32 %v2608_v56, %v2568_v6  ;;  %v6457_v48 = vld [vmem:[#allocation8 + $0x6a0] ss:$16 sps:$4 sm:$0xff]   ;;  %v6417_v6 = vld [vmem:[#allocation8 + $0x404] ss:$16 sps:$4 sm:$0xff]  }
 0x1e8   :  { %v2610_v62 = vpop.f32.mrf.mxu1  ;;  %4422 = vmatpush2.bf16.msra.mxu0 %v6370_v58  ;;  %v6463_v56 = vld [vmem:[#allocation8 + $0x680] ss:$16 sps:$4 sm:$0xff]  }
 0x1e9   :  { %4381 = vmatpush2.bf16.msra.mxu1 %v6361_v55  ;;  %4423 = vmatprep.subr.bf16.mxu0 %v6378_v60  ;;  %v6408_v55 = vld [vmem:[#allocation8 + $0x464] ss:$16 sps:$4 sm:$0xff]   ;;  %v6406_v58 = vld [vmem:[#allocation8 + $0x460] ss:$16 sps:$4 sm:$0xff]  }
 0x1ea   :  { %4382 = vmatprep.subr.bf16.mxu1 %v6369_v57  ;;  %v2611_v2 = vpop.f32.mrf.mxu1  ;;  %v6471_v57 = vld [vmem:[#allocation8 + $0x664] ss:$16 sps:$4 sm:$0xff]   ;;  %v6469_v62 = vld [vmem:[#allocation8 + $0x660] ss:$16 sps:$4 sm:$0xff]  }
 0x1eb   :  { %v6411_v60 = vld [vmem:[#allocation8 + $0x444] ss:$16 sps:$4 sm:$0xff]   ;;  %v6475_v2 = vld [vmem:[#allocation8 + $0x640] ss:$16 sps:$4 sm:$0xff]  }
 0x1ec   :  { %v2647_v19 = vpop.f32.mrf.mxu1  ;;  %4424 = vmatpush2.bf16.msra.mxu0 %v6376_v4  ;;  %v6412_v4 = vld [vmem:[#allocation8 + $0x420] ss:$16 sps:$4 sm:$0xff]  }
 0x1ed   :  { %4383 = vmatpush2.bf16.msra.mxu1 %v6367_v1  ;;  %4425 = vmatprep.subr.bf16.mxu0 %v6384_v7  ;;  %v2648_v27 = vadd.f32 %v2647_v19, %v2607_v8  ;;  %v6414_v1 = vld [vmem:[#allocation8 + $0x424] ss:$16 sps:$4 sm:$0xff]   ;;  %v6481_v7 = vld [vmem:[#allocation8 + $0x620] ss:$16 sps:$4 sm:$0xff]  }
 0x1ee   :  { %4384 = vmatprep.subr.bf16.mxu1 %v6375_v3  ;;  %v2649_v13 = vpop.f32.mrf.mxu1  ;;  %v6483_v3 = vld [vmem:[#allocation8 + $0x624] ss:$16 sps:$4 sm:$0xff]  }
 0x1ef   :  { %v2650_v17 = vadd.f32 %v2649_v13, %v2609_v10  ;;  %v2980_v34 = vmax.f32 %v2648_v27, 0.0  ;;  %v6489_v19 = vld [vmem:[#allocation8 + $0x604] ss:$16 sps:$4 sm:$0xff]   ;;  %v6495_v13 = vld [vmem:[#allocation8 + $0xec] ss:$16 sps:$4 sm:$0xff]  }
 0x1f0   :  { %v2651_v20 = vpop.f32.mrf.mxu1  ;;  %4426 = vmatpush2.bf16.msra.mxu0 %v6382_v14  ;;  %v6420_v10 = vld [vmem:[#allocation8 + $0x5e4] ss:$16 sps:$4 sm:$0xff]   ;;  %v6430_v27 = vld [vmem:[#allocation8 + $0x560] ss:$16 sps:$4 sm:$0xff]  }
 0x1f1   :  { %v2981_v22 = vmax.f32 %v2650_v17, 0.0  ;;  %4385 = vmatpush2.bf16.msra.mxu1 %v6373_v12  ;;  %4427 = vmatprep.subr.bf16.mxu0 %v6390_v18  ;;  %v7016_v41 = vpack.c.bf16 %v2980_v34, %v2980_v34  ;;  %v6487_v12 = vld [vmem:[#allocation8 + $0x600] ss:$16 sps:$4 sm:$0xff]   ;;  %v6423_v14 = vld [vmem:[#allocation8 + $0x5c4] ss:$16 sps:$4 sm:$0xff]  }
 0x1f2   :  { %4386 = vmatprep.subr.bf16.mxu1 %v6381_v36  ;;  %v2652_v5 = vpop.f32.mrf.mxu1  ;;  %v6418_v36 = vld [vmem:[#allocation8 + $0x5e0] ss:$16 sps:$4 sm:$0xff]   ;;  %v6426_v20 = vld [vmem:[#allocation8 + $0x5a4] ss:$16 sps:$4 sm:$0xff]  }
 0x1f3   :  { %v7010_v28 = vpack.c.bf16 %v2981_v22, %v2981_v22  ;;  %v6421_v17 = vld [vmem:[#allocation8 + $0x5c0] ss:$16 sps:$4 sm:$0xff]   ;;  %v6429_v5 = vld [vmem:[#allocation8 + $0x584] ss:$16 sps:$4 sm:$0xff]  }
 0x1f4   :  { %4428 = vmatpush2.bf16.msra.mxu0 %v6388_v26  ;;  %v6424_v22 = vld [vmem:[#allocation8 + $0x5a0] ss:$16 sps:$4 sm:$0xff]   ;;  %v6432_v26 = vld [vmem:[#allocation8 + $0x564] ss:$16 sps:$4 sm:$0xff]  }
 0x1f5   :  { %4387 = vmatpush2.bf16.msra.mxu1 %v6379_v23  ;;  %4431 = vmatprep.mubr.bf16.mxu0 %v7010_v28 }
 0x1f6   :  { %4388 = vmatprep.subr.bf16.mxu1 %v6387_v24  ;;  %4429 = vmatprep.subr.bf16.mxu0 %v6393_v29  ;;  %v6427_v24 = vld [vmem:[#allocation8 + $0x580] ss:$16 sps:$4 sm:$0xff]   ;;  %v6435_v29 = vld [vmem:[#allocation8 + $0x544] ss:$16 sps:$4 sm:$0xff]  }
 0x1f8   :  { %4430 = vmatpush2.bf16.msra.mxu0 %v6391_v32 }
 0x1f9   :  { %4389 = vmatpush2.bf16.msra.mxu1 %v6385_v31  ;;  %4481 = vmatprep.subr.bf16.mxu0 %v6447_v35  ;;  %v6436_v35 = vld [vmem:[#allocation8 + $0x520] ss:$16 sps:$4 sm:$0xff]  }
 0x1fa   :  { %4440 = vmatprep.subr.bf16.mxu1 %v6396_v33  ;;  %v6438_v33 = vld [vmem:[#allocation8 + $0x524] ss:$16 sps:$4 sm:$0xff]  }
 0x1fb   :  { %4432 = vmatmul.mubr.bf16.vlgmr.msra.gmra.mxu0 %v7016_v41 }
 0x1fc   :  { %4391 = vmatmul.mubr.bf16.vlgmr.msra.gmra.mxu1 %v7014_v0  ;;  %4482 = vmatpush1.bf16.msra.mxu0 %v6445_v39 }
 0x1fd   :  { %4441 = vmatpush1.bf16.msra.mxu1 %v6394_v37  ;;  %4483 = vmatprep.subr.bf16.mxu0 %v6453_v42  ;;  %v6439_v42 = vld [vmem:[#allocation8 + $0x500] ss:$16 sps:$4 sm:$0xff]  }
 0x1fe   :  { %4442 = vmatprep.subr.bf16.mxu1 %v6399_v11  ;;  %4513 = vmatprep.mubr.bf16.mxu0 %v6854_v16  ;;  %v6441_v11 = vld [vmem:[#allocation8 + $0x504] ss:$16 sps:$4 sm:$0xff]  }
 0x200   :  { %4484 = vmatpush1.bf16.msra.mxu0 %v6451_v45 }
 0x201   :  { %4443 = vmatpush1.bf16.msra.mxu1 %v6397_v52  ;;  %4485 = vmatprep.subr.bf16.mxu0 %v6459_v46 }
 0x202   :  { %4444 = vmatprep.subr.bf16.mxu1 %v6402_v43  ;;  %v6444_v43 = vld [vmem:[#allocation8 + $0x2ec] ss:$16 sps:$4 sm:$0xff]  }
 0x204   :  { %4486 = vmatpush1.bf16.msra.mxu0 %v6457_v48 }
 0x205   :  { %4445 = vmatpush1.bf16.msra.mxu1 %v6400_v47  ;;  %4487 = vmatprep.subr.bf16.mxu0 %v6465_v50  ;;  %v541_v47 = vsub.s32 4, %v6954_v30 }
 0x206   :  { %4446 = vmatprep.subr.bf16.mxu1 %v6405_v49  ;;  %v545_v49 = vsub.s32 5, %v6954_v30 }
 0x207   :  { %v542_v50 = vrot.slane %v7000_v53, %v541_v47 }
 0x208   :  { %4488 = vmatpush1.bf16.msra.mxu0 %v6463_v56 }
 0x209   :  { %4447 = vmatpush1.bf16.msra.mxu1 %v6403_v54  ;;  %4489 = vmatprep.subr.bf16.mxu0 %v6471_v57 }
 0x20a   :  { %4448 = vmatprep.subr.bf16.mxu1 %v6408_v55  ;;  %v546_v55 = vrot.slane %v7000_v53, %v545_v49 }
 0x20c   :  { %4490 = vmatpush1.bf16.msra.mxu0 %v6469_v62 }
 0x20d   :  { %4449 = vmatpush1.bf16.msra.mxu1 %v6406_v58  ;;  %4491 = vmatprep.subr.bf16.mxu0 %v6477_v9 }
 0x20e   :  { %4450 = vmatprep.subr.bf16.mxu1 %v6411_v60 }
 0x210   :  { %4492 = vmatpush1.bf16.msra.mxu0 %v6475_v2 }
 0x211   :  { %4451 = vmatpush1.bf16.msra.mxu1 %v6409_v63  ;;  %4493 = vmatprep.subr.bf16.mxu0 %v6483_v3 }
 0x212   :  { %4452 = vmatprep.subr.bf16.mxu1 %v6414_v1 }
 0x214   :  { %4494 = vmatpush1.bf16.msra.mxu0 %v6481_v7 }
 0x215   :  { %4453 = vmatpush1.bf16.msra.mxu1 %v6412_v4  ;;  %4495 = vmatprep.subr.bf16.mxu0 %v6489_v19 }
 0x216   :  { %4454 = vmatprep.subr.bf16.mxu1 %v6417_v6 }
 0x218   :  { %4496 = vmatpush1.bf16.msra.mxu0 %v6487_v12 }
 0x219   :  { %4455 = vmatpush1.bf16.msra.mxu1 %v6415_v21  ;;  %4522 = vmatprep.subr.bf16.mxu0 %v6495_v13  ;;  %v6442_v13 = vld [vmem:[#allocation8 + $0x2e8] ss:$16 sps:$4 sm:$0xff]  }
 0x21a   :  { %4456 = vmatprep.subr.bf16.mxu1 %v6420_v10 }
 0x21b   :  { %v2688_v15 = vpop.f32.mrf.mxu0 }
 0x21c   :  { %v2689_v57 = vadd.f32 %v2688_v15, %v542_v50  ;;  %v6448_v15 = vld [vmem:[#allocation8 + $0x2c8] ss:$16 sps:$4 sm:$0xff]  }
 0x21d   :  { %4457 = vmatpush2.bf16.msra.mxu1 %v6418_v36  ;;  %v2690_v18 = vpop.f32.mrf.mxu0 }
 0x21e   :  { %4458 = vmatprep.subr.bf16.mxu1 %v6423_v14  ;;  %v2691_v60 = vadd.f32 %v2690_v18, %v546_v55  ;;  %v6450_v14 = vld [vmem:[#allocation8 + $0x2cc] ss:$16 sps:$4 sm:$0xff]   ;;  %v6454_v18 = vld [vmem:[#allocation8 + $0x2a8] ss:$16 sps:$4 sm:$0xff]  }
 0x21f   :  { %v2692_v8 = vpop.f32.mrf.mxu0  ;;  %v6492_v55 = vld [vmem:[#allocation8 + $0x3ec] ss:$16 sps:$4 sm:$0xff]  }
 0x220   :  { %v6460_v8 = vld [vmem:[#allocation8 + $0x288] ss:$16 sps:$4 sm:$0xff]  }
 0x221   :  { %4459 = vmatpush2.bf16.msra.mxu1 %v6421_v17  ;;  %v2693_v23 = vpop.f32.mrf.mxu0  ;;  %v6456_v17 = vld [vmem:[#allocation8 + $0x2ac] ss:$16 sps:$4 sm:$0xff]  }
 0x222   :  { %4460 = vmatprep.subr.bf16.mxu1 %v6426_v20  ;;  %v6462_v20 = vld [vmem:[#allocation8 + $0x28c] ss:$16 sps:$4 sm:$0xff]  }
 0x225   :  { %4461 = vmatpush2.bf16.msra.mxu1 %v6424_v22  ;;  %v6468_v22 = vld [vmem:[#allocation8 + $0x26c] ss:$16 sps:$4 sm:$0xff]  }
 0x226   :  { %4462 = vmatprep.subr.bf16.mxu1 %v6429_v5  ;;  %v549_v5 = vsub.s32 6, %v6954_v30 }
 0x229   :  { %4463 = vmatpush2.bf16.msra.mxu1 %v6427_v24  ;;  %v6466_v24 = vld [vmem:[#allocation8 + $0x268] ss:$16 sps:$4 sm:$0xff]  }
 0x22a   :  { %4464 = vmatprep.subr.bf16.mxu1 %v6432_v26 }
 0x22c   :  { %v2729_v31 = vpop.f32.mrf.mxu1 }
 0x22d   :  { %4465 = vmatpush2.bf16.msra.mxu1 %v6430_v27  ;;  %v2730_v62 = vadd.f32 %v2729_v31, %v2689_v57  ;;  %v6474_v27 = vld [vmem:[#allocation8 + $0x24c] ss:$16 sps:$4 sm:$0xff]  }
 0x22e   :  { %v2731_v32 = vpop.f32.mrf.mxu1  ;;  %4466 = vmatprep.subr.bf16.mxu1 %v6435_v29  ;;  %v550_v29 = vrot.slane %v7000_v53, %v549_v5  ;;  %v6531_v5 = vld [vmem:[#allocation8 + $0x2c] ss:$16 sps:$4 sm:$0xff]  }
 0x22f   :  { %v2732_v63 = vadd.f32 %v2731_v32, %v2691_v60  ;;  %v6493_v60 = vld [vmem:[#allocation8 + $0xe8] ss:$16 sps:$4 sm:$0xff]  }
 0x230   :  { %v2733_v34 = vpop.f32.mrf.mxu1 }
 0x231   :  { %4467 = vmatpush2.bf16.msra.mxu1 %v6433_v59  ;;  %v6472_v59 = vld [vmem:[#allocation8 + $0x248] ss:$16 sps:$4 sm:$0xff]  }
 0x232   :  { %v2734_v37 = vpop.f32.mrf.mxu1  ;;  %4468 = vmatprep.subr.bf16.mxu1 %v6438_v33  ;;  %v6480_v33 = vld [vmem:[#allocation8 + $0x22c] ss:$16 sps:$4 sm:$0xff]  }
 0x234   :  { %v2811_v39 = vpop.f32.mrf.mxu1 }
 0x235   :  { %4469 = vmatpush2.bf16.msra.mxu1 %v6436_v35 }
 0x236   :  { %v2813_v52 = vpop.f32.mrf.mxu1  ;;  %4470 = vmatprep.subr.bf16.mxu1 %v6441_v11 }
 0x238   :  { %v2815_v45 = vpop.f32.mrf.mxu1 }
 0x239   :  { %4471 = vmatpush2.bf16.msra.mxu1 %v6439_v42 }
 0x23a   :  { %v2816_v46 = vpop.f32.mrf.mxu1  ;;  %4563 = vmatprep.subr.bf16.mxu1 %v6444_v43  ;;  %v6486_v43 = vld [vmem:[#allocation8 + $0x20c] ss:$16 sps:$4 sm:$0xff]  }
 0x254   :  { %v5689_v48 = vpop.f32.mrf.mxu1 }
 0x256   :  { %v5690_v54 = vpop.f32.mrf.mxu1 }
 0x257   :  { %v5691_v31 = vadd.f32 %v5690_v54, %v5689_v48  ;;  %v6484_v48 = vld [vmem:[#allocation8 + $0x208] ss:$16 sps:$4 sm:$0xff]  }
 0x258   :  { %v5692_v56 = vpop.f32.mrf.mxu1 }
 0x259   :  { %v2853_v11 = vadd.f32 %v5691_v31, %v550_v29  ;;  %v6532_v29 = vld [vmem:[#allocation8 + $0x308] ss:$16 sps:$4 sm:$0xff]  }
 0x25a   :  { %v5693_v58 = vpop.f32.mrf.mxu1  ;;  %v6535_v31 = vld [vmem:[#allocation8 + $0x8] ss:$16 sps:$4 sm:$0xff]  }
 0x25b   :  { %v2770_v9 = vpop.f32.mrf.mxu0  ;;  %v6490_v58 = vld [vmem:[#allocation8 + $0x3e8] ss:$16 sps:$4 sm:$0xff]  }
 0x25c   :  { %v2771_v1 = vadd.f32 %v2770_v9, %v2730_v62  ;;  %v6498_v9 = vld [vmem:[#allocation8 + $0x3cc] ss:$16 sps:$4 sm:$0xff]  }
 0x25d   :  { %v2772_v2 = vpop.f32.mrf.mxu0 }
 0x25e   :  { %v2812_v3 = vadd.f32 %v2811_v39, %v2771_v1  ;;  %v2773_v4 = vadd.f32 %v2772_v2, %v2732_v63  ;;  %v6478_v39 = vld [vmem:[#allocation8 + $0x228] ss:$16 sps:$4 sm:$0xff]   ;;  %v6501_v63 = vld [vmem:[#allocation8 + $0xcc] ss:$16 sps:$4 sm:$0xff]  }
 0x25f   :  { %v2774_v6 = vpop.f32.mrf.mxu0  ;;  %v6496_v1 = vld [vmem:[#allocation8 + $0x3c8] ss:$16 sps:$4 sm:$0xff]  }
 0x260   :  { %v2814_v7 = vadd.f32 %v2813_v52, %v2773_v4  ;;  %v2982_v19 = vmax.f32 %v2812_v3, 0.0  ;;  %v6499_v2 = vld [vmem:[#allocation8 + $0xc8] ss:$16 sps:$4 sm:$0xff]   ;;  %v6504_v3 = vld [vmem:[#allocation8 + $0x3ac] ss:$16 sps:$4 sm:$0xff]  }
 0x261   :  { %v2775_v21 = vpop.f32.mrf.mxu0  ;;  %v6507_v4 = vld [vmem:[#allocation8 + $0xac] ss:$16 sps:$4 sm:$0xff]   ;;  %v6502_v6 = vld [vmem:[#allocation8 + $0x3a8] ss:$16 sps:$4 sm:$0xff]  }
 0x262   :  { %v2983_v10 = vmax.f32 %v2814_v7, 0.0  ;;  %v7027_v36 = vpack.c.bf16 %v2982_v19, %v2982_v19  ;;  %v6505_v7 = vld [vmem:[#allocation8 + $0xa8] ss:$16 sps:$4 sm:$0xff]   ;;  %v6510_v19 = vld [vmem:[#allocation8 + $0x38c] ss:$16 sps:$4 sm:$0xff]  }
 0x263   :  { %v6513_v21 = vld [vmem:[#allocation8 + $0x8c] ss:$16 sps:$4 sm:$0xff]  }
 0x264   :  { %v7025_v12 = vpack.c.bf16 %v2983_v10, %v2983_v10  ;;  %v6508_v10 = vld [vmem:[#allocation8 + $0x388] ss:$16 sps:$4 sm:$0xff]  }
 0x266   :  { %4472 = vmatprep.mubr.bf16.mxu1 %v7025_v12 }
 0x267   :  { %4473 = vmatmul.mubr.bf16.vlgmr.msra.gmra.mxu1 %v7027_v36 }
 0x268   :  { %4564 = vmatpush1.bf16.msra.mxu1 %v6442_v13  ;;  %4595 = vmatprep.mubr.bf16.mxu1 %v7010_v28  ;;  %v6511_v13 = vld [vmem:[#allocation8 + $0x88] ss:$16 sps:$4 sm:$0xff]  }
 0x269   :  { %4565 = vmatprep.subr.bf16.mxu1 %v6450_v14  ;;  %v6516_v14 = vld [vmem:[#allocation8 + $0x36c] ss:$16 sps:$4 sm:$0xff]  }
 0x26c   :  { %4566 = vmatpush1.bf16.msra.mxu1 %v6448_v15  ;;  %v6514_v15 = vld [vmem:[#allocation8 + $0x368] ss:$16 sps:$4 sm:$0xff]  }
 0x26d   :  { %4567 = vmatprep.subr.bf16.mxu1 %v6456_v17  ;;  %v6517_v17 = vld [vmem:[#allocation8 + $0x68] ss:$16 sps:$4 sm:$0xff]  }
 0x270   :  { %4568 = vmatpush1.bf16.msra.mxu1 %v6454_v18  ;;  %v6522_v18 = vld [vmem:[#allocation8 + $0x34c] ss:$16 sps:$4 sm:$0xff]  }
 0x271   :  { %4569 = vmatprep.subr.bf16.mxu1 %v6462_v20  ;;  %v6525_v20 = vld [vmem:[#allocation8 + $0x4c] ss:$16 sps:$4 sm:$0xff]  }
 0x274   :  { %v5711_v23 = vpop.f32.mrf.mxu1  ;;  %4570 = vmatpush1.bf16.msra.mxu1 %v6460_v8  ;;  %v6520_v8 = vld [vmem:[#allocation8 + $0x348] ss:$16 sps:$4 sm:$0xff]  }
 0x275   :  { %4571 = vmatprep.subr.bf16.mxu1 %v6468_v22  ;;  %v6523_v22 = vld [vmem:[#allocation8 + $0x48] ss:$16 sps:$4 sm:$0xff]  }
 0x276   :  { %v5712_v26 = vpop.f32.mrf.mxu1 }
 0x277   :  { %v5713_v34 = vadd.f32 %v5712_v26, %v5711_v23  ;;  %v6528_v23 = vld [vmem:[#allocation8 + $0x32c] ss:$16 sps:$4 sm:$0xff]   ;;  %v6529_v26 = vld [vmem:[#allocation8 + $0x28] ss:$16 sps:$4 sm:$0xff]  }
 0x278   :  { %v5714_v28 = vpop.f32.mrf.mxu1  ;;  %4572 = vmatpush1.bf16.msra.mxu1 %v6466_v24  ;;  %v6526_v24 = vld [vmem:[#allocation8 + $0x328] ss:$16 sps:$4 sm:$0xff]  }
 0x279   :  { %4573 = vmatprep.subr.bf16.mxu1 %v6474_v27  ;;  %v2893_v45 = vadd.f32 %v5713_v34, %v2853_v11  ;;  %v6534_v27 = vld [vmem:[#allocation8 + $0x30c] ss:$16 sps:$4 sm:$0xff]   ;;  %v6541_v34 = vld [vmem:[#allocation8 + $0x1e8] ss:$16 sps:$4 sm:$0xff]  }
 0x27a   :  { %v5715_v32 = vpop.f32.mrf.mxu1  ;;  %v6537_v28 = vld [vmem:[#allocation8 + $0xc] ss:$16 sps:$4 sm:$0xff]   ;;  %v6544_v11 = vld [vmem:[#allocation8 + $0x6c8] ss:$16 sps:$4 sm:$0xff]  }
 0x27b   :  { %v5733_v35 = vpop.f32.mrf.mxu0  ;;  %v6543_v32 = vld [vmem:[#allocation8 + $0x1ec] ss:$16 sps:$4 sm:$0xff]  }
 0x27c   :  { %v2972_v37 = vpop.f32.mrf.mxu1  ;;  %4574 = vmatpush1.bf16.msra.mxu1 %v6472_v59  ;;  %v6540_v59 = vld [vmem:[#allocation8 + $0x6ec] ss:$16 sps:$4 sm:$0xff]  }
 0x27d   :  { %v5734_v42 = vpop.f32.mrf.mxu0  ;;  %4575 = vmatprep.subr.bf16.mxu1 %v6480_v33  ;;  %v6538_v33 = vld [vmem:[#allocation8 + $0x6e8] ss:$16 sps:$4 sm:$0xff]  }
 0x27e   :  { %v5789_v52 = vpop.f32.mrf.mxu1  ;;  %v5735_v46 = vadd.f32 %v5734_v42, %v5733_v35  ;;  %v6546_v35 = vld [vmem:[#allocation8 + $0x6cc] ss:$16 sps:$4 sm:$0xff]  }
 0x27f   :  { %v5736_v47 = vpop.f32.mrf.mxu0  ;;  %v6552_v42 = vld [vmem:[#allocation8 + $0x6ac] ss:$16 sps:$4 sm:$0xff]  }
 0x280   :  { %v2975_v53 = vpop.f32.mrf.mxu1  ;;  %v2933_v49 = vadd.f32 %v5735_v46, %v2893_v45  ;;  %4576 = vmatpush1.bf16.msra.mxu1 %v6478_v39  ;;  %v6547_v39 = vld [vmem:[#allocation8 + $0x1c8] ss:$16 sps:$4 sm:$0xff]   ;;  %v6555_v52 = vld [vmem:[#allocation8 + $0x1ac] ss:$16 sps:$4 sm:$0xff]  }
 0x281   :  { %v5737_v50 = vpop.f32.mrf.mxu0  ;;  %4577 = vmatprep.subr.bf16.mxu1 %v6486_v43  ;;  %v6550_v43 = vld [vmem:[#allocation8 + $0x6a8] ss:$16 sps:$4 sm:$0xff]   ;;  %v6558_v46 = vld [vmem:[#allocation8 + $0x68c] ss:$16 sps:$4 sm:$0xff]  }
 0x282   :  { %v5790_v54 = vpop.f32.mrf.mxu1  ;;  %v2973_v56 = vadd.f32 %v2972_v37, %v2933_v49  ;;  %v6549_v37 = vld [vmem:[#allocation8 + $0x1cc] ss:$16 sps:$4 sm:$0xff]   ;;  %v6553_v45 = vld [vmem:[#allocation8 + $0x1a8] ss:$16 sps:$4 sm:$0xff]   ;;  %v7040_v50 = vld [vmem:[#allocation10] sm:$0xf] }
 0x283   :  { %v6561_v47 = vld [vmem:[#allocation8 + $0x18c] ss:$16 sps:$4 sm:$0xff]   ;;  %v6559_v53 = vld [vmem:[#allocation8 + $0x188] ss:$16 sps:$4 sm:$0xff]  }
 0x284   :  { %v2984_v57 = vmax.f32 %v2973_v56, 0.0  ;;  %4578 = vmatpush1.bf16.msra.mxu1 %v6484_v48  ;;  %v6567_v49 = vld [vmem:[#allocation8 + $0x16c] ss:$16 sps:$4 sm:$0xff]   ;;  %v6562_v48 = vld [vmem:[#allocation8 + $0x668] ss:$16 sps:$4 sm:$0xff]  }
 0x285   :  { %4579 = vmatprep.subr.bf16.mxu1 %v6492_v55  ;;  %v6565_v54 = vld [vmem:[#allocation8 + $0x168] ss:$16 sps:$4 sm:$0xff]   ;;  %v6570_v55 = vld [vmem:[#allocation8 + $0x64c] ss:$16 sps:$4 sm:$0xff]  }
 0x286   :  { %v7034_v62 = vpack.c.bf16 %v2984_v57, %v2984_v57  ;;  %v6573_v56 = vld [vmem:[#allocation8 + $0x14c] ss:$16 sps:$4 sm:$0xff]   ;;  %v3221_v57 = vrot.slane %v7040_v50, %v525_v38  ;;  %v6577_v38 = vld [vmem:[#allocation8 + $0x128] ss:$16 sps:$4 sm:$0xff]  }
 0x288   :  { %4580 = vmatpush2.bf16.msra.mxu1 %v6490_v58  ;;  %4514 = vmatmul.mubr.bf16.vlgmr.msra.gmra.mxu0 %v7034_v62  ;;  %v6568_v58 = vld [vmem:[#allocation8 + $0x648] ss:$16 sps:$4 sm:$0xff]  }
 0x289   :  { %4523 = vmatpush1.bf16.msra.mxu0 %v6493_v60  ;;  %4554 = vmatprep.mubr.bf16.mxu0 %v6992_v61  ;;  %v6519_v61 = vld [vmem:[#allocation8 + $0x6c] ss:$16 sps:$4 sm:$0xff]   ;;  %v6571_v60 = vld [vmem:[#allocation8 + $0x148] ss:$16 sps:$4 sm:$0xff]  }
 0x28a   :  { %4581 = vmatprep.subr.bf16.mxu1 %v6498_v9  ;;  %4524 = vmatprep.subr.bf16.mxu0 %v6501_v63  ;;  %v6576_v9 = vld [vmem:[#allocation8 + $0x62c] ss:$16 sps:$4 sm:$0xff]   ;;  %v3225_v63 = vrot.slane %v7040_v50, %v529_v40 }
 0x28c   :  { %4582 = vmatpush2.bf16.msra.mxu1 %v6496_v1  ;;  %v6579_v1 = vld [vmem:[#allocation8 + $0x12c] ss:$16 sps:$4 sm:$0xff]  }
 0x28d   :  { %4525 = vmatpush1.bf16.msra.mxu0 %v6499_v2  ;;  %4583 = vmatprep.subr.bf16.mxu1 %v6504_v3 }
 0x28e   :  { %4526 = vmatprep.subr.bf16.mxu0 %v6507_v4 }
 0x290   :  { %4584 = vmatpush2.bf16.msra.mxu1 %v6502_v6  ;;  %v6574_v6 = vld [vmem:[#allocation8 + $0x628] ss:$16 sps:$4 sm:$0xff]  }
 0x291   :  { %4527 = vmatpush1.bf16.msra.mxu0 %v6505_v7  ;;  %4585 = vmatprep.subr.bf16.mxu1 %v6510_v19  ;;  %v6582_v19 = vld [vmem:[#allocation8 + $0x60c] ss:$16 sps:$4 sm:$0xff]  }
 0x292   :  { %4528 = vmatprep.subr.bf16.mxu0 %v6513_v21 }
 0x294   :  { %4586 = vmatpush2.bf16.msra.mxu1 %v6508_v10 }
 0x295   :  { %4529 = vmatpush1.bf16.msra.mxu0 %v6511_v13  ;;  %4587 = vmatprep.subr.bf16.mxu1 %v6516_v14  ;;  %v6585_v14 = vld [vmem:[#allocation8 + $0x10c] ss:$16 sps:$4 sm:$0xff]  }
 0x296   :  { %4530 = vmatprep.subr.bf16.mxu0 %v6519_v61 }
 0x298   :  { %4588 = vmatpush2.bf16.msra.mxu1 %v6514_v15 }
 0x299   :  { %4531 = vmatpush1.bf16.msra.mxu0 %v6517_v17  ;;  %4589 = vmatprep.subr.bf16.mxu1 %v6522_v18  ;;  %v6580_v17 = vld [vmem:[#allocation8 + $0x608] ss:$16 sps:$4 sm:$0xff]  }
 0x29a   :  { %4532 = vmatprep.subr.bf16.mxu0 %v6525_v20  ;;  %v6583_v20 = vld [vmem:[#allocation8 + $0x108] ss:$16 sps:$4 sm:$0xff]  }
 0x29c   :  { %4590 = vmatpush2.bf16.msra.mxu1 %v6520_v8  ;;  %v6634_v8 = vld [vmem:[#allocation11 + $0x78] sm:$0xff]  }
 0x29d   :  { %4533 = vmatpush1.bf16.msra.mxu0 %v6523_v22  ;;  %4591 = vmatprep.subr.bf16.mxu1 %v6528_v23  ;;  %v6588_v23 = vld [vmem:[#allocation8 + $0x4ec] ss:$16 sps:$4 sm:$0xff]  }
 0x29e   :  { %4534 = vmatprep.subr.bf16.mxu0 %v6531_v5  ;;  %v6635_v5 = vld [vmem:[#allocation11 + $0x38] sm:$0xff]  }
 0x2a0   :  { %4592 = vmatpush2.bf16.msra.mxu1 %v6526_v24  ;;  %v6586_v24 = vld [vmem:[#allocation8 + $0x4e8] ss:$16 sps:$4 sm:$0xff]  }
 0x2a1   :  { %4535 = vmatpush1.bf16.msra.mxu0 %v6529_v26  ;;  %4593 = vmatprep.subr.bf16.mxu1 %v6534_v27  ;;  %v6591_v26 = vld [vmem:[#allocation8 + $0x4cc] ss:$16 sps:$4 sm:$0xff]   ;;  %v6636_v27 = vld [vmem:[#allocation11 + $0x70] sm:$0xff]  }
 0x2a2   :  { %4536 = vmatprep.subr.bf16.mxu0 %v6537_v28  ;;  %v6637_v28 = vld [vmem:[#allocation11 + $0x30] sm:$0xff]  }
 0x2a4   :  { %4594 = vmatpush2.bf16.msra.mxu1 %v6532_v29  ;;  %v6589_v29 = vld [vmem:[#allocation8 + $0x4c8] ss:$16 sps:$4 sm:$0xff]  }
 0x2a5   :  { %4537 = vmatpush1.bf16.msra.mxu0 %v6535_v31  ;;  %4645 = vmatprep.subr.bf16.mxu1 %v6540_v59  ;;  %v6638_v31 = vld [vmem:[#allocation11 + $0x68] sm:$0xff]  }
 0x2a6   :  { %4538 = vmatprep.subr.bf16.mxu0 %v6543_v32  ;;  %v6594_v59 = vld [vmem:[#allocation8 + $0x4ac] ss:$16 sps:$4 sm:$0xff]  }
 0x2a7   :  { %4596 = vmatmul.mubr.bf16.vlgmr.msra.gmra.mxu1 %v7016_v41  ;;  %v6556_v41 = vld [vmem:[#allocation8 + $0x688] ss:$16 sps:$4 sm:$0xff]   ;;  %v6639_v32 = vld [vmem:[#allocation11 + $0x28] sm:$0xff]  }
 0x2a8   :  { %4646 = vmatpush1.bf16.msra.mxu1 %v6538_v33  ;;  %4677 = vmatprep.mubr.bf16.mxu1 %v6854_v16  ;;  %v6564_v16 = vld [vmem:[#allocation8 + $0x66c] ss:$16 sps:$4 sm:$0xff]   ;;  %v6592_v33 = vld [vmem:[#allocation8 + $0x4a8] ss:$16 sps:$4 sm:$0xff]  }
 0x2a9   :  { %4539 = vmatpush2.bf16.msra.mxu0 %v6541_v34  ;;  %4647 = vmatprep.subr.bf16.mxu1 %v6546_v35  ;;  %v6640_v34 = vld [vmem:[#allocation11 + $0x60] sm:$0xff]  }
 0x2aa   :  { %4540 = vmatprep.subr.bf16.mxu0 %v6549_v37  ;;  %v6595_v35 = vld [vmem:[#allocation8 + $0x488] ss:$16 sps:$4 sm:$0xff]   ;;  %v6642_v37 = vld [vmem:[#allocation11 + $0x58] sm:$0xff]  }
 0x2ac   :  { %4648 = vmatpush1.bf16.msra.mxu1 %v6544_v11  ;;  %v6643_v11 = vld [vmem:[#allocation11 + $0x18] sm:$0xff]  }
 0x2ad   :  { %4541 = vmatpush2.bf16.msra.mxu0 %v6547_v39  ;;  %4649 = vmatprep.subr.bf16.mxu1 %v6552_v42  ;;  %v6598_v39 = vld [vmem:[#allocation8 + $0x468] ss:$16 sps:$4 sm:$0xff]  }
 0x2ae   :  { %4542 = vmatprep.subr.bf16.mxu0 %v6555_v52  ;;  %v6644_v42 = vld [vmem:[#allocation11 + $0x50] sm:$0xff]   ;;  %v6603_v52 = vld [vmem:[#allocation8 + $0x44c] ss:$16 sps:$4 sm:$0xff]  }
 0x2b0   :  { %4650 = vmatpush1.bf16.msra.mxu1 %v6550_v43  ;;  %v6645_v43 = vld [vmem:[#allocation11 + $0x10] sm:$0xff]  }
 0x2b1   :  { %4543 = vmatpush2.bf16.msra.mxu0 %v6553_v45  ;;  %4651 = vmatprep.subr.bf16.mxu1 %v6558_v46  ;;  %v6601_v45 = vld [vmem:[#allocation8 + $0x448] ss:$16 sps:$4 sm:$0xff]   ;;  %v6646_v46 = vld [vmem:[#allocation11 + $0x48] sm:$0xff]  }
 0x2b2   :  { %4544 = vmatprep.subr.bf16.mxu0 %v6561_v47  ;;  %v6606_v47 = vld [vmem:[#allocation8 + $0x42c] ss:$16 sps:$4 sm:$0xff]  }
 0x2b4   :  { %4652 = vmatpush1.bf16.msra.mxu1 %v6556_v41  ;;  %v6647_v41 = vld [vmem:[#allocation11 + $0x8] sm:$0xff]  }
 0x2b5   :  { %4545 = vmatpush2.bf16.msra.mxu0 %v6559_v53  ;;  %4653 = vmatprep.subr.bf16.mxu1 %v6564_v16  ;;  %v6604_v53 = vld [vmem:[#allocation8 + $0x428] ss:$16 sps:$4 sm:$0xff]  }
 0x2b6   :  { %4546 = vmatprep.subr.bf16.mxu0 %v6567_v49  ;;  %v6648_v16 = vld [vmem:[#allocation11 + $0x40] sm:$0xff]   ;;  %v6609_v49 = vld [vmem:[#allocation8 + $0x40c] ss:$16 sps:$4 sm:$0xff]  }
 0x2b8   :  { %4654 = vmatpush1.bf16.msra.mxu1 %v6562_v48  ;;  %v6649_v48 = vld [vmem:[#allocation11] sm:$0xff]  }
 0x2b9   :  { %4547 = vmatpush2.bf16.msra.mxu0 %v6565_v54  ;;  %4655 = vmatprep.subr.bf16.mxu1 %v6570_v55  ;;  %v6607_v54 = vld [vmem:[#allocation8 + $0x408] ss:$16 sps:$4 sm:$0xff]   ;;  %v6612_v55 = vld [vmem:[#allocation8 + $0x5ec] ss:$16 sps:$4 sm:$0xff]  }
 0x2ba   :  { %4548 = vmatprep.subr.bf16.mxu0 %v6573_v56  ;;  %v6610_v56 = vld [vmem:[#allocation8 + $0x5e8] ss:$16 sps:$4 sm:$0xff]  }
 0x2bb   :  { %v4433_v4 = vpop.f32.mrf.mxu0 }
 0x2bc   :  { %v4392_v2 = vpop.f32.mrf.mxu1  ;;  %4656 = vmatpush1.bf16.msra.mxu1 %v6568_v58  ;;  %v6613_v58 = vld [vmem:[#allocation8 + $0x5c8] ss:$16 sps:$4 sm:$0xff]  }
 0x2bd   :  { %v4393_v3 = vadd.f32 %v4392_v2, %v3221_v57  ;;  %4549 = vmatpush2.bf16.msra.mxu0 %v6571_v60  ;;  %4657 = vmatprep.subr.bf16.mxu1 %v6576_v9  ;;  %v4435_v13 = vpop.f32.mrf.mxu0  ;;  %v6615_v57 = vld [vmem:[#allocation8 + $0x5cc] ss:$16 sps:$4 sm:$0xff]   ;;  %v6616_v9 = vld [vmem:[#allocation8 + $0x5a8] ss:$16 sps:$4 sm:$0xff]  }
 0x2be   :  { %v4394_v7 = vpop.f32.mrf.mxu1  ;;  %4550 = vmatprep.subr.bf16.mxu0 %v6579_v1  ;;  %v6618_v60 = vld [vmem:[#allocation8 + $0x5ac] ss:$16 sps:$4 sm:$0xff]   ;;  %v6619_v1 = vld [vmem:[#allocation8 + $0x588] ss:$16 sps:$4 sm:$0xff]  }
 0x2bf   :  { %v4395_v21 = vadd.f32 %v4394_v7, %v3225_v63  ;;  %v7048_v10 = vadd.f32 %v4433_v4, %v4393_v3  ;;  %v4437_v15 = vpop.f32.mrf.mxu0  ;;  %v6621_v63 = vld [vmem:[#allocation8 + $0x58c] ss:$16 sps:$4 sm:$0xff]   ;;  %v6622_v3 = vld [vmem:[#allocation8 + $0x568] ss:$16 sps:$4 sm:$0xff]  }
 0x2c0   :  { %v4396_v61 = vpop.f32.mrf.mxu1  ;;  %4658 = vmatpush1.bf16.msra.mxu1 %v6574_v6  ;;  %v6624_v2 = vld [vmem:[#allocation8 + $0x56c] ss:$16 sps:$4 sm:$0xff]   ;;  %v6625_v6 = vld [vmem:[#allocation8 + $0x548] ss:$16 sps:$4 sm:$0xff]  }
 0x2c1   :  { %v7050_v40 = vadd.f32 %v4435_v13, %v4395_v21  ;;  %4551 = vmatpush2.bf16.msra.mxu0 %v6577_v38  ;;  %4659 = vmatprep.subr.bf16.mxu1 %v6582_v19  ;;  %v4438_v22 = vpop.f32.mrf.mxu0  ;;  %v6627_v4 = vld [vmem:[#allocation8 + $0x54c] ss:$16 sps:$4 sm:$0xff]   ;;  %v6628_v38 = vld [vmem:[#allocation8 + $0x528] ss:$16 sps:$4 sm:$0xff]  }
 0x2c2   :  { %v4397_v18 = vpop.f32.mrf.mxu1  ;;  %4552 = vmatprep.subr.bf16.mxu0 %v6585_v14  ;;  %v6630_v7 = vld [vmem:[#allocation8 + $0x52c] ss:$16 sps:$4 sm:$0xff]   ;;  %v6631_v21 = vld [vmem:[#allocation8 + $0x508] ss:$16 sps:$4 sm:$0xff]  }
 0x2c3   :  { %v6633_v19 = vld [vmem:[#allocation8 + $0x50c] ss:$16 sps:$4 sm:$0xff]   ;;  %v6652_v61 = vld [vmem:[#allocation11 + $0xf0] sm:$0xff]  }
 0x2c4   :  { %4660 = vmatpush1.bf16.msra.mxu1 %v6580_v17  ;;  %v6650_v13 = vld [vmem:[#allocation11 + $0xf8] sm:$0xff]   ;;  %v6653_v15 = vld [vmem:[#allocation11 + $0xb0] sm:$0xff]   ;;  %v6654_v17 = vld [vmem:[#allocation11 + $0xe8] sm:$0xff]  }
 0x2c5   :  { %4553 = vmatpush2.bf16.msra.mxu0 %v6583_v20  ;;  %5741 = vmatprep.subr.bf16.mxu1 %v6634_v8  ;;  %v6651_v14 = vld [vmem:[#allocation11 + $0xb8] sm:$0xff]   ;;  %v6655_v18 = vld [vmem:[#allocation11 + $0xa8] sm:$0xff]   ;;  %v6656_v20 = vld [vmem:[#allocation11 + $0xe0] sm:$0xff]  }
 0x2c6   :  { %4604 = vmatprep.subr.bf16.mxu0 %v6588_v23  ;;  %v6657_v8 = vld [vmem:[#allocation11 + $0xa0] sm:$0xff]   ;;  %v6658_v22 = vld [vmem:[#allocation11 + $0xd8] sm:$0xff]  }
 0x2c7   :  { %4678 = vmatmul.mubr.bf16.vlgmr.msra.gmra.mxu1 %v7034_v62  ;;  %v6597_v62 = vld [vmem:[#allocation8 + $0x48c] ss:$16 sps:$4 sm:$0xff]  }
 0x2c8   :  { %4555 = vmatmul.mubr.bf16.vlgmr.msra.gmra.mxu0 %v7014_v0  ;;  %5742 = vmatpush3.bf16.msra.mxu1 %v6635_v5  ;;  %v6641_v0 = vld [vmem:[#allocation11 + $0x20] sm:$0xff]   ;;  %v6659_v23 = vld [vmem:[#allocation11 + $0x98] sm:$0xff]  }
 0x2c9   :  { %4605 = vmatpush1.bf16.msra.mxu0 %v6586_v24  ;;  %4636 = vmatprep.mubr.bf16.mxu0 %v7025_v12  ;;  %v6600_v12 = vld [vmem:[#allocation8 + $0x46c] ss:$16 sps:$4 sm:$0xff]  }
 0x2ca   :  { %4606 = vmatprep.subr.bf16.mxu0 %v6591_v26  ;;  %5743 = vmatprep.subr.bf16.mxu1 %v6636_v27 }
 0x2cc   :  { %5744 = vmatpush3.bf16.msra.mxu1 %v6637_v28 }
 0x2cd   :  { %4607 = vmatpush1.bf16.msra.mxu0 %v6589_v29  ;;  %5745 = vmatprep.subr.bf16.mxu1 %v6638_v31 }
 0x2ce   :  { %4608 = vmatprep.subr.bf16.mxu0 %v6594_v59  ;;  %v6660_v59 = vld [vmem:[#allocation11 + $0xd0] sm:$0xff]  }
 0x2d0   :  { %5746 = vmatpush3.bf16.msra.mxu1 %v6639_v32 }
 0x2d1   :  { %4609 = vmatpush1.bf16.msra.mxu0 %v6592_v33  ;;  %5747 = vmatprep.subr.bf16.mxu1 %v6640_v34  ;;  %v6661_v33 = vld [vmem:[#allocation11 + $0x90] sm:$0xff]  }
 0x2d2   :  { %4610 = vmatprep.subr.bf16.mxu0 %v6597_v62 }
 0x2d4   :  { %5748 = vmatpush3.bf16.msra.mxu1 %v6641_v0 }
 0x2d5   :  { %4611 = vmatpush1.bf16.msra.mxu0 %v6595_v35  ;;  %5749 = vmatprep.subr.bf16.mxu1 %v6642_v37  ;;  %v6662_v37 = vld [vmem:[#allocation11 + $0xc8] sm:$0xff]  }
 0x2d6   :  { %4612 = vmatprep.subr.bf16.mxu0 %v6600_v12 }
 0x2d8   :  { %5750 = vmatpush3.bf16.msra.mxu1 %v6643_v11  ;;  %v6663_v11 = vld [vmem:[#allocation11 + $0x88] sm:$0xff]  }
 0x2d9   :  { %4613 = vmatpush1.bf16.msra.mxu0 %v6598_v39  ;;  %5751 = vmatprep.subr.bf16.mxu1 %v6644_v42 }
 0x2da   :  { %4614 = vmatprep.subr.bf16.mxu0 %v6603_v52 }
 0x2dc   :  { %5752 = vmatpush3.bf16.msra.mxu1 %v6645_v43 }
 0x2dd   :  { %4615 = vmatpush1.bf16.msra.mxu0 %v6601_v45  ;;  %5753 = vmatprep.subr.bf16.mxu1 %v6646_v46 }
 0x2de   :  { %4616 = vmatprep.subr.bf16.mxu0 %v6606_v47 }
 0x2e0   :  { %5754 = vmatpush3.bf16.msra.mxu1 %v6647_v41 }
 0x2e1   :  { %4617 = vmatpush1.bf16.msra.mxu0 %v6604_v53  ;;  %5755 = vmatprep.subr.bf16.mxu1 %v6648_v16 }
 0x2e2   :  { %4618 = vmatprep.subr.bf16.mxu0 %v6609_v49 }
 0x2e4   :  { %5756 = vmatpush3.bf16.msra.mxu1 %v6649_v48 }
 0x2e5   :  { %4619 = vmatpush1.bf16.msra.mxu0 %v6607_v54 }
 0x2e6   :  { %4620 = vmatprep.subr.bf16.mxu0 %v6612_v55 }
 0x2e9   :  { %4621 = vmatpush2.bf16.msra.mxu0 %v6610_v56  ;;  %v3229_v56 = vrot.slane %v7040_v50, %v533_v51 }
 0x2ea   :  { %4622 = vmatprep.subr.bf16.mxu0 %v6615_v57  ;;  %v3233_v57 = vrot.slane %v7040_v50, %v537_v44 }
 0x2ed   :  { %4623 = vmatpush2.bf16.msra.mxu0 %v6613_v58 }
 0x2ee   :  { %4624 = vmatprep.subr.bf16.mxu0 %v6618_v60 }
 0x2f1   :  { %4625 = vmatpush2.bf16.msra.mxu0 %v6616_v9 }
 0x2f2   :  { %4626 = vmatprep.subr.bf16.mxu0 %v6621_v63 }
 0x2f5   :  { %4627 = vmatpush2.bf16.msra.mxu0 %v6619_v1 }
 0x2f6   :  { %4628 = vmatprep.subr.bf16.mxu0 %v6624_v2 }
 0x2f9   :  { %4629 = vmatpush2.bf16.msra.mxu0 %v6622_v3 }
 0x2fa   :  { %4630 = vmatprep.subr.bf16.mxu0 %v6627_v4 }
 0x2fd   :  { %4631 = vmatpush2.bf16.msra.mxu0 %v6625_v6 }
 0x2fe   :  { %4632 = vmatprep.subr.bf16.mxu0 %v6630_v7 }
 0x301   :  { %4633 = vmatpush2.bf16.msra.mxu0 %v6628_v38 }
 0x302   :  { %4634 = vmatprep.subr.bf16.mxu0 %v6633_v19 }
 0x305   :  { %4635 = vmatpush2.bf16.msra.mxu0 %v6631_v21 }
 0x306   :  { %5763 = vmatprep.subr.bf16.mxu0 %v6650_v13 }
 0x308   :  { %4637 = vmatmul.mubr.bf16.vlgmr.msra.gmra.mxu0 %v7027_v36 }
 0x309   :  { %5764 = vmatpush3.bf16.msra.mxu0 %v6651_v14 }
 0x30a   :  { %5765 = vmatprep.subr.bf16.mxu0 %v6652_v61 }
 0x30d   :  { %5766 = vmatpush3.bf16.msra.mxu0 %v6653_v15 }
 0x30e   :  { %5767 = vmatprep.subr.bf16.mxu0 %v6654_v17  ;;  %v5640_v17 = vld [vmem:[#allocation13] ss:$0 sm:$0xff] }
 0x311   :  { %5768 = vmatpush3.bf16.msra.mxu0 %v6655_v18 }
 0x312   :  { %5769 = vmatprep.subr.bf16.mxu0 %v6656_v20  ;;  %v5038_v20 = vand.u32 127, %v523_v25 }
 0x314   :  { %vm5039_vm2 = vcmp.lt.s32.totalorder %v5038_v20, 10 }
 0x315   :  { %5770 = vmatpush3.bf16.msra.mxu0 %v6657_v8 }
 0x316   :  { %5771 = vmatprep.subr.bf16.mxu0 %v6658_v22 }
 0x319   :  { %5772 = vmatpush3.bf16.msra.mxu0 %v6659_v23 }
 0x31a   :  { %5773 = vmatprep.subr.bf16.mxu0 %v6660_v59 }
 0x31d   :  { %5774 = vmatpush3.bf16.msra.mxu0 %v6661_v33 }
 0x31e   :  { %5775 = vmatprep.subr.bf16.mxu0 %v6662_v37 }
 0x321   :  { %5776 = vmatpush3.bf16.msra.mxu0 %v6663_v11 }
 0x327   :  { %v4474_v36 = vpop.f32.mrf.mxu1 }
 0x328   :  { %v4475_v27 = vadd.f32 %v4474_v36, %v7048_v10  ;;  %v6664_v10 = vld [vmem:[#allocation11 + $0xc0] sm:$0xff]  }
 0x329   :  { %v4476_v5 = vpop.f32.mrf.mxu1  ;;  %5777 = vmatprep.subr.bf16.mxu0 %v6664_v10 }
 0x32a   :  { %v4477_v29 = vadd.f32 %v4476_v5, %v7050_v40  ;;  %v6665_v40 = vld [vmem:[#allocation11 + $0x80] sm:$0xff]  }
 0x32b   :  { %v4478_v24 = vpop.f32.mrf.mxu1  ;;  %5778 = vmatpush3.bf16.msra.mxu0 %v6665_v40 }
 0x32d   :  { %v4479_v26 = vpop.f32.mrf.mxu1 }
 0x348   :  { %v4515_v28 = vpop.f32.mrf.mxu0 }
 0x349   :  { %v4516_v31 = vadd.f32 %v4515_v28, %v4475_v27 }
 0x34a   :  { %v4517_v32 = vpop.f32.mrf.mxu0 }
 0x34b   :  { %v4518_v34 = vadd.f32 %v4517_v32, %v4477_v29  ;;  %v4686_v62 = vmax.f32 %v4516_v31, 0.0 }
 0x34c   :  { %v4519_v0 = vpop.f32.mrf.mxu0 }
 0x34d   :  { %v4687_v35 = vmax.f32 %v4518_v34, 0.0  ;;  %v4690_v42 = vpack.c.bf16 %v4686_v62, %v4686_v62 }
 0x34e   :  { %v4520_v12 = vpop.f32.mrf.mxu0 }
 0x34f   :  { %v4691_v39 = vpack.c.bf16 %v4687_v35, %v4687_v35 }
 0x351   :  { %4989 = vmatprep.mubr.bf16.mxu1 %v4691_v39 }
 0x352   :  { %4990 = vmatmul.mubr.bf16.vlgmr.msra.gmra.mxu1 %v4690_v42 }
 0x367   :  { %v4597_v52 = vpop.f32.mrf.mxu1 }
 0x369   :  { %v4599_v43 = vpop.f32.mrf.mxu1 }
 0x36b   :  { %v4601_v45 = vpop.f32.mrf.mxu1 }
 0x36d   :  { %v4602_v46 = vpop.f32.mrf.mxu1 }
 0x387   :  { %v4679_v47 = vpop.f32.mrf.mxu1 }
 0x388   :  { %v4556_v41 = vpop.f32.mrf.mxu0 }
 0x389   :  { %v4681_v53 = vpop.f32.mrf.mxu1  ;;  %v4557_v58 = vadd.f32 %v4556_v41, %v3229_v56 }
 0x38a   :  { %v4558_v16 = vpop.f32.mrf.mxu0 }
 0x38b   :  { %v4683_v49 = vpop.f32.mrf.mxu1  ;;  %v4559_v60 = vadd.f32 %v4558_v16, %v3233_v57  ;;  %v4598_v9 = vadd.f32 %v4597_v52, %v4557_v58 }
 0x38c   :  { %v4560_v48 = vpop.f32.mrf.mxu0 }
 0x38d   :  { %v4684_v54 = vpop.f32.mrf.mxu1  ;;  %v4600_v2 = vadd.f32 %v4599_v43, %v4559_v60 }
 0x38e   :  { %v4561_v55 = vpop.f32.mrf.mxu0 }
 0x3c8   :  { %v4638_v63 = vpop.f32.mrf.mxu0 }
 0x3c9   :  { %v4639_v1 = vadd.f32 %v4638_v63, %v4598_v9 }
 0x3ca   :  { %v4640_v3 = vpop.f32.mrf.mxu0 }
 0x3cb   :  { %v4680_v4 = vadd.f32 %v4679_v47, %v4639_v1  ;;  %v4641_v6 = vadd.f32 %v4640_v3, %v4600_v2 }
 0x3cc   :  { %v4642_v7 = vpop.f32.mrf.mxu0 }
 0x3cd   :  { %v4682_v38 = vadd.f32 %v4681_v53, %v4641_v6  ;;  %v4688_v19 = vmax.f32 %v4680_v4, 0.0 }
 0x3ce   :  { %v4643_v21 = vpop.f32.mrf.mxu0 }
 0x3cf   :  { %v4689_v13 = vmax.f32 %v4682_v38, 0.0  ;;  %v4692_v51 = vpack.c.bf16 %v4688_v19, %v4688_v19 }
 0x3d1   :  { %v4693_v14 = vpack.c.bf16 %v4689_v13, %v4689_v13 }
 0x3d3   :  { %5029 = vmatprep.mubr.bf16.mxu0 %v4693_v14 }
 0x3d4   :  { %5030 = vmatmul.mubr.bf16.vlgmr.msra.gmra.mxu0 %v4692_v51 }
 0x412   :  { %v5757_v30 = vpop.f32.mrf.mxu1 }
 0x414   :  { %v5758_v44 = vpop.f32.mrf.mxu1 }
 0x415   :  { %v5759_v50 = vadd.f32 %v5758_v44, %v5757_v30 }
 0x416   :  { %v5760_v61 = vpop.f32.mrf.mxu1 }
 0x417   :  { %v4992_v22 = vadd.f32 %v5759_v50, %v5640_v17 }
 0x418   :  { %v5761_v15 = vpop.f32.mrf.mxu1 }
 0x494   :  { %v5779_v18 = vpop.f32.mrf.mxu0 }
 0x496   :  { %v5780_v8 = vpop.f32.mrf.mxu0 }
 0x497   :  { %v5781_v23 = vadd.f32 %v5780_v8, %v5779_v18 }
 0x498   :  { %v5782_v36 = vpop.f32.mrf.mxu0 }
 0x499   :  { %v5032_v5 = vadd.f32 %v5781_v23, %v4992_v22 }
 0x49a   :  { %v5783_v24 = vpop.f32.mrf.mxu0 }
 0x49b   :  { %v5040_v26 = vsel %vm5039_vm2, %v5032_v5, -inf }
 0x49c   :  { %5041 = vmax.xlane.f32.xlu0 %v5040_v26 }
 0x525   :  { %v5042_v27 = vpop.xlane.xlu0 %5041 }
 0x526   :  { %v5043_v28 = vsub.f32 %v5040_v26, %v5042_v27 }
 0x528   :  { %v5044_v29 = vmul.f32 1.442695, %v5043_v28 }
 0x52a   :  { %6666 = vpow2.f32 %v5044_v29 }
 0x537   :  { %v6667_v31 = vpop.eup %6666 }
 0x538   :  { %5046 = vadd.xlane.f32.xlu0 %v6667_v31 }
 0x5c1   :  { %v5047_v59 = vpop.xlane.xlu0 %5046 }
 0x5c2   :  { %6668 = vrcp.f32 %v5047_v59 }
 0x5cf   :  { %v6669_v25 = vpop.eup %6668 }
 0x5d0   :  { %v5049_v32 = vmul.f32 %v6669_v25, %v6667_v31 }
 0x5d2   :  { %5050 = vst [vmem:[#allocation14] sm:$0xff] %v5049_v32 }
 0x5d3   :  { %6822 = shalt.err (!%p6819_p11)
}
 0x5d4   :  { %5060 = dma.vmem_to_hbm [thread:$0]  %s5058_s6, 128, %s7075_s7, [#allocation4]  }
 0x5d5   :  { %6839 = dma.done.wait [#allocation4], 128  }
 0x5d6   :  { %6840 = vsyncadd [#allocation4], 4294967168 }
 0x5d7   :  { %5064 = vsyncpa [#allocation3], 1 }
 0x5d8   :  { %5065 = vsyncpa [#allocation6], 1 }
 0x5d9   :  { %5066 = vsyncpa [#allocation9], 1 }
 0x5da   :  { %5067 = vsyncpa [#allocation12], 1 }
 0x5db   :  { %5068 = vsyncpa [#allocation4], 1 }

</bundles_post_ra>
